<compile_context>
chip_gen: v6e
topology: v6e:2x2x1
jax: 0.10.0
libtpu: 0.0.40
codegen_flags: <defaults>
</compile_context>

<pallas_src>
import jax
import jax.numpy as jnp
from jax import lax
from jax.experimental import pallas as pl
from jax.experimental.pallas import tpu as pltpu

RELU_SLOPE = 0.2
EPS = 1e-5  # nn.InstanceNorm2d default


def _make_kernel(H, W, Cin, Cout, slope):
    Hh = H // 2
    inv_hw = 1.0 / float(H * W)
    assert W & (W - 1) == 0, "lane fold assumes W is a power of two"
    log2w = W.bit_length() - 1

    def kernel(xr_ref, a1_ref, aid_ref, a2_ref, ad_ref,
               b1_ref, b2_ref, bid_ref, g_ref, be_ref, osel_ref,
               mu_ref, md_ref, seld_ref,
               out_ref, down_ref):
        f32 = jnp.float32

        def lk(v):                                   # LeakyReLU
            return jnp.where(v >= 0, v, slope * v)

        def mm(a, b):                                # MXU matmul, f32 accum
            return jnp.dot(a, b, preferred_element_type=f32)

        # Row taps for the 3x3 convs: circular sublane roll (XLU) + precomputed
        # boundary mask zeroing the wrapped row (conv zero-padding).
        def shift_up(v):                             # row h <- row h-1, row 0 -> 0
            return pltpu.roll(v, 1, axis=0) * mu_ref[...]

        def shift_dn(v):                             # row h <- row h+1, last -> 0
            return pltpu.roll(v, H - 1, axis=0) * md_ref[...]

        # Per-channel fold/broadcast across the W lane groups: log2(W) lane
        # rolls + adds (replaces the old (1,WC)x(WC,WC) MXU matmul).
        def fold(v):
            for k in range(log2w):
                v = v + pltpu.roll(v, Cout << k, axis=1)
            return v

        x = xr_ref[...]                              # (H, W*Cin)

        # ---------------- conv_1: 3x3, pad 1, bias (banded matmuls) ----------
        o1 = (mm(shift_up(x), a1_ref[0]) + mm(x, a1_ref[1])
              + mm(shift_dn(x), a1_ref[2]) + b1_ref[...])     # (H, W*Cout)

        # -------- HIN: InstanceNorm2d (affine) on first Cout//2 channels -----
        mean_l = fold(jnp.sum(o1, axis=0, keepdims=True)) * inv_hw
        cent = o1 - mean_l                           # two-pass variance
        var_l = fold(jnp.sum(cent * cent, axis=0, keepdims=True)) * inv_hw
        inv_l = lax.rsqrt(var_l + EPS)
        gi = g_ref[...] * inv_l                      # gamma (zero on 2nd half)
        scale = gi + osel_ref[...]                   # 1.0 on non-normed channels
        shift = be_ref[...] - mean_l * gi            # 0.0 on non-normed channels
        act = lk(o1 * scale + shift)                 # relu_1

        # -------- conv_2 (3x3) + relu_2, then + identity (1x1 conv of x) -----
        o2 = (mm(shift_up(act), a2_ref[0]) + mm(act, a2_ref[1])
              + mm(shift_dn(act), a2_ref[2]) + b2_ref[...])
        res = lk(o2) + mm(x, aid_ref[...]) + bid_ref[...]
        out_ref[...] = res.astype(out_ref.dtype)     # (H, W*Cout), lane dense

        # -------- downsample: 4x4 conv, stride 2, pad 1, no bias -------------
        rows = mm(seld_ref[...], res)                # stride-2 row gather (tiny MXU)
        d = mm(rows[0:Hh], ad_ref[0])
        d = d + mm(rows[Hh:2 * Hh], ad_ref[1])
        d = d + mm(rows[2 * Hh:3 * Hh], ad_ref[2])
        d = d + mm(rows[3 * Hh:4 * Hh], ad_ref[3])
        down_ref[...] = d.astype(down_ref.dtype)     # (Hh, Wh*Cout), 1 vreg here

    return kernel


def _band(w_k, n_in, n_out, stride, pad):
    """Banded matrix for one row-tap of a conv (weight-only preprocessing).

    w_k: (KX, Ci, Co).  Returns A of shape (n_in*Ci, n_out*Co) with
    A[wi*Ci+ci, wo*Co+co] = w_k[wi - stride*wo + pad, ci, co] (0 if tap OOB),
    so (row-major-flattened input row) @ A = flattened output row.
    """
    KX, Ci, Co = w_k.shape
    wi = jnp.arange(n_in)
    wo = jnp.arange(n_out)
    kx = wi[:, None] - stride * wo[None, :] + pad            # (n_in, n_out)
    valid = (kx >= 0) & (kx < KX)
    tap = jnp.clip(kx, 0, KX - 1)
    a = jnp.where(valid[:, :, None, None], w_k[tap], 0.0)    # (n_in, n_out, Ci, Co)
    return jnp.transpose(a, (0, 2, 1, 3)).reshape(n_in * Ci, n_out * Co)


def unet_conv_block(x_nchw, p, slope=RELU_SLOPE):
    """Returns (out_down, out) in NCHW, matching the PyTorch module."""
    N, Cin, H, W = x_nchw.shape
    Cout = p["w1"].shape[-1]
    half = Cout // 2
    Hh, Wh = H // 2, W // 2
    f32 = jnp.float32

    # input: NCHW -> NHWC -> lane-dense (N, H, W*Cin)
    # (when chained inside HINet, keep this layout between blocks and drop the
    #  boundary transposes; they exist here only for the standalone test)
    xr = jnp.transpose(x_nchw, (0, 2, 3, 1)).astype(f32).reshape(N, H, W * Cin)

    # weight-only preprocessing (banding / tiling, once, in plain XLA)
    a1 = jnp.stack([_band(p["w1"][k], W, W, 1, 1) for k in range(3)])
    a2 = jnp.stack([_band(p["w2"][k], W, W, 1, 1) for k in range(3)])
    aid = _band(p["wid"][0], W, W, 1, 0)
    ad = jnp.stack([_band(p["wdown"][k], W, Wh, 2, 1) for k in range(4)])

    def lane(v):            # per-channel vector -> (1, W*C) pre-tiled lane vector
        return jnp.tile(v.astype(f32), W)[None, :]

    b1l = lane(p["b1"])
    b2l = lane(p["b2"])
    bidl = lane(p["bid"])
    gl = lane(jnp.concatenate([p["gamma"].astype(f32), jnp.zeros((Cout - half,), f32)]))
    bel = lane(jnp.concatenate([p["beta"].astype(f32), jnp.zeros((Cout - half,), f32)]))
    osel = lane(jnp.concatenate([jnp.zeros((half,), f32), jnp.ones((Cout - half,), f32)]))

    # grid-invariant structural constants, built once in the wrapper
    mask_up = (jnp.arange(H) > 0).astype(f32)[:, None]        # (H,1): zero row 0
    mask_dn = (jnp.arange(H) < H - 1).astype(f32)[:, None]    # (H,1): zero row H-1
    q = jnp.arange(4 * Hh)[:, None]
    j = jnp.arange(H)[None, :]
    sel_d = (j == 2 * (q % Hh) + q // Hh - 1).astype(f32)     # (4*Hh, H)

    kernel = _make_kernel(H, W, Cin, Cout, slope)

    def full(a):
        return pl.BlockSpec(a.shape, lambda b, _n=a.ndim: (0,) * _n)

    out, down = pl.pallas_call(
        kernel,
        out_shape=(jax.ShapeDtypeStruct((N, H, W * Cout), f32),
                   jax.ShapeDtypeStruct((N, Hh, Wh * Cout), f32)),
        grid=(N,),
        in_specs=[pl.BlockSpec((None, H, W * Cin), lambda b: (b, 0, 0)),
                  full(a1), full(aid), full(a2), full(ad),
                  full(b1l), full(b2l), full(bidl),
                  full(gl), full(bel), full(osel),
                  full(mask_up), full(mask_dn), full(sel_d)],
        out_specs=(pl.BlockSpec((None, H, W * Cout), lambda b: (b, 0, 0)),
                   pl.BlockSpec((None, Hh, Wh * Cout), lambda b: (b, 0, 0))),
        compiler_params=pltpu.CompilerParams(dimension_semantics=("parallel",)),
    )(xr, a1, aid, a2, ad, b1l, b2l, bidl, gl, bel, osel, mask_up, mask_dn, sel_d)

    out_nchw = jnp.transpose(out.reshape(N, H, W, Cout), (0, 3, 1, 2))
    down_nchw = jnp.transpose(down.reshape(N, Hh, Wh, Cout), (0, 3, 1, 2))
    return down_nchw, out_nchw


# ------------------------- pure-JAX reference ---------------------------
def _leaky(x, s):
    return jnp.where(x >= 0, x, s * x)


def _conv_nhwc(x, w, stride, pad):
    return lax.conv_general_dilated(
        x, w, (stride, stride), ((pad, pad), (pad, pad)),
        dimension_numbers=("NHWC", "HWIO", "NHWC"),
        precision=lax.Precision.HIGHEST)


def reference_forward(x_nchw, p, slope=RELU_SLOPE):
    x = jnp.transpose(x_nchw, (0, 2, 3, 1)).astype(jnp.float32)
    Cout = p["w1"].shape[-1]
    half = Cout // 2
    out = _conv_nhwc(x, p["w1"], 1, 1) + p["b1"]
    o1, o2 = out[..., :half], out[..., half:]
    mean = o1.mean(axis=(1, 2), keepdims=True)
    var = ((o1 - mean) ** 2).mean(axis=(1, 2), keepdims=True)
    o1 = (o1 - mean) / jnp.sqrt(var + EPS) * p["gamma"] + p["beta"]
    out = _leaky(jnp.concatenate([o1, o2], axis=-1), slope)
    out = _leaky(_conv_nhwc(out, p["w2"], 1, 1) + p["b2"], slope)
    out = out + _conv_nhwc(x, p["wid"], 1, 0) + p["bid"]
    down = _conv_nhwc(out, p["wdown"], 2, 1)
    return (jnp.transpose(down, (0, 3, 1, 2)), jnp.transpose(out, (0, 3, 1, 2)))


if __name__ == "__main__":
    N, Cin, Cout, H, W = 2, 4, 8, 16, 16
    key = jax.random.PRNGKey(0)
    ks = jax.random.split(key, 10)
    p = {
        "w1":    0.1 * jax.random.normal(ks[0], (3, 3, Cin, Cout), jnp.float32),
        "b1":    0.1 * jax.random.normal(ks[1], (Cout,), jnp.float32),
        "gamma": 1.0 + 0.1 * jax.random.normal(ks[2], (Cout // 2,), jnp.float32),
        "beta":  0.1 * jax.random.normal(ks[3], (Cout // 2,), jnp.float32),
        "w2":    0.1 * jax.random.normal(ks[4], (3, 3, Cout, Cout), jnp.float32),
        "b2":    0.1 * jax.random.normal(ks[5], (Cout,), jnp.float32),
        "wid":   0.1 * jax.random.normal(ks[6], (1, 1, Cin, Cout), jnp.float32),
        "bid":   0.1 * jax.random.normal(ks[7], (Cout,), jnp.float32),
        "wdown": 0.1 * jax.random.normal(ks[8], (4, 4, Cout, Cout), jnp.float32),
    }
    x = jax.random.normal(ks[9], (N, Cin, H, W), jnp.float32)   # NCHW like PyTorch

    down, out = unet_conv_block(x, p)
    jax.block_until_ready((down, out))

    down_r, out_r = reference_forward(x, p)
    assert jnp.allclose(out, out_r, atol=5e-3, rtol=5e-3), \
        float(jnp.max(jnp.abs(out - out_r)))
    assert jnp.allclose(down, down_r, atol=5e-3, rtol=5e-3), \
        float(jnp.max(jnp.abs(down - down_r)))
    print("KERNEL_OK")
</pallas_src>

<mosaic_0001>
module attributes {stable_mosaic.version = 11 : i64} {
  func.func @kernel(%arg0: i32, %arg1: memref<1x16x64xf32, #tpu.memory_space<vmem>>, %arg2: memref<3x64x128xf32, #tpu.memory_space<vmem>>, %arg3: memref<64x128xf32, #tpu.memory_space<vmem>>, %arg4: memref<3x128x128xf32, #tpu.memory_space<vmem>>, %arg5: memref<4x128x64xf32, #tpu.memory_space<vmem>>, %arg6: memref<1x128xf32, #tpu.memory_space<vmem>>, %arg7: memref<1x128xf32, #tpu.memory_space<vmem>>, %arg8: memref<1x128xf32, #tpu.memory_space<vmem>>, %arg9: memref<1x128xf32, #tpu.memory_space<vmem>>, %arg10: memref<1x128xf32, #tpu.memory_space<vmem>>, %arg11: memref<1x128xf32, #tpu.memory_space<vmem>>, %arg12: memref<16x1xf32, #tpu.memory_space<vmem>>, %arg13: memref<16x1xf32, #tpu.memory_space<vmem>>, %arg14: memref<32x16xf32, #tpu.memory_space<vmem>>, %arg15: memref<1x16x128xf32, #tpu.memory_space<vmem>>, %arg16: memref<1x8x64xf32, #tpu.memory_space<vmem>>) attributes {dimension_semantics = [#tpu.dimension_semantics<parallel>], iteration_bounds = array<i64: 2>, scalar_prefetch = 0 : i64, scratch_operands = 0 : i64, tpu.core_type = #tpu.core_type<tc>, window_params = [{transform_indices = @transform_0, window_bounds = array<i64: 1, 16, 64>}, {pipeline_mode = #tpu.pipeline_mode<synchronous>, transform_indices = @transform_1, window_bounds = array<i64: 3, 64, 128>}, {pipeline_mode = #tpu.pipeline_mode<synchronous>, transform_indices = @transform_2, window_bounds = array<i64: 64, 128>}, {pipeline_mode = #tpu.pipeline_mode<synchronous>, transform_indices = @transform_3, window_bounds = array<i64: 3, 128, 128>}, {pipeline_mode = #tpu.pipeline_mode<synchronous>, transform_indices = @transform_4, window_bounds = array<i64: 4, 128, 64>}, {pipeline_mode = #tpu.pipeline_mode<synchronous>, transform_indices = @transform_5, window_bounds = array<i64: 1, 128>}, {pipeline_mode = #tpu.pipeline_mode<synchronous>, transform_indices = @transform_6, window_bounds = array<i64: 1, 128>}, {pipeline_mode = #tpu.pipeline_mode<synchronous>, transform_indices = @transform_7, window_bounds = array<i64: 1, 128>}, {pipeline_mode = #tpu.pipeline_mode<synchronous>, transform_indices = @transform_8, window_bounds = array<i64: 1, 128>}, {pipeline_mode = #tpu.pipeline_mode<synchronous>, transform_indices = @transform_9, window_bounds = array<i64: 1, 128>}, {pipeline_mode = #tpu.pipeline_mode<synchronous>, transform_indices = @transform_10, window_bounds = array<i64: 1, 128>}, {pipeline_mode = #tpu.pipeline_mode<synchronous>, transform_indices = @transform_11, window_bounds = array<i64: 16, 1>}, {pipeline_mode = #tpu.pipeline_mode<synchronous>, transform_indices = @transform_12, window_bounds = array<i64: 16, 1>}, {pipeline_mode = #tpu.pipeline_mode<synchronous>, transform_indices = @transform_13, window_bounds = array<i64: 32, 16>}, {transform_indices = @transform_14, window_bounds = array<i64: 1, 16, 128>}, {transform_indices = @transform_15, window_bounds = array<i64: 1, 8, 64>}]} {
    %c0 = arith.constant 0 : index
    %c0_0 = arith.constant 0 : index
    %c0_1 = arith.constant 0 : index
    %0 = vector.load %arg1[%c0, %c0_0, %c0_1] : memref<1x16x64xf32, #tpu.memory_space<vmem>>, vector<1x16x64xf32>
    %1 = vector.shape_cast %0 : vector<1x16x64xf32> to vector<16x64xf32>
    %c1_i32 = arith.constant 1 : i32
    %2 = tpu.dynamic_rotate %1 by %c1_i32 dim 0 : vector<16x64xf32>, i32 -> vector<16x64xf32>
    %c0_2 = arith.constant 0 : index
    %c0_3 = arith.constant 0 : index
    %3 = vector.load %arg12[%c0_2, %c0_3] : memref<16x1xf32, #tpu.memory_space<vmem>>, vector<16x1xf32>
    %4 = vector.broadcast %3 : vector<16x1xf32> to vector<16x64xf32>
    %5 = arith.mulf %2, %4 : vector<16x64xf32>
    %c0_4 = arith.constant 0 : index
    %c0_5 = arith.constant 0 : index
    %c0_6 = arith.constant 0 : index
    %6 = vector.load %arg2[%c0_4, %c0_5, %c0_6] : memref<3x64x128xf32, #tpu.memory_space<vmem>>, vector<1x64x128xf32>
    %7 = vector.shape_cast %6 : vector<1x64x128xf32> to vector<64x128xf32>
    %cst = arith.constant dense<0.000000e+00> : vector<16x128xf32>
    %8 = tpu.matmul %5, %7, %cst {dimension_numbers = #tpu.dot_dimension_numbers<[1], [0], [0], [1], [0, 0, 1, 1], [], []>} : vector<16x64xf32>, vector<64x128xf32>, vector<16x128xf32> -> vector<16x128xf32>
    %c1 = arith.constant 1 : index
    %c0_7 = arith.constant 0 : index
    %c0_8 = arith.constant 0 : index
    %9 = vector.load %arg2[%c1, %c0_7, %c0_8] : memref<3x64x128xf32, #tpu.memory_space<vmem>>, vector<1x64x128xf32>
    %10 = vector.shape_cast %9 : vector<1x64x128xf32> to vector<64x128xf32>
    %cst_9 = arith.constant dense<0.000000e+00> : vector<16x128xf32>
    %11 = tpu.matmul %1, %10, %cst_9 {dimension_numbers = #tpu.dot_dimension_numbers<[1], [0], [0], [1], [0, 0, 1, 1], [], []>} : vector<16x64xf32>, vector<64x128xf32>, vector<16x128xf32> -> vector<16x128xf32>
    %12 = arith.addf %8, %11 : vector<16x128xf32>
    %c15_i32 = arith.constant 15 : i32
    %13 = tpu.dynamic_rotate %1 by %c15_i32 dim 0 : vector<16x64xf32>, i32 -> vector<16x64xf32>
    %c0_10 = arith.constant 0 : index
    %c0_11 = arith.constant 0 : index
    %14 = vector.load %arg13[%c0_10, %c0_11] : memref<16x1xf32, #tpu.memory_space<vmem>>, vector<16x1xf32>
    %15 = vector.broadcast %14 : vector<16x1xf32> to vector<16x64xf32>
    %16 = arith.mulf %13, %15 : vector<16x64xf32>
    %c2 = arith.constant 2 : index
    %c0_12 = arith.constant 0 : index
    %c0_13 = arith.constant 0 : index
    %17 = vector.load %arg2[%c2, %c0_12, %c0_13] : memref<3x64x128xf32, #tpu.memory_space<vmem>>, vector<1x64x128xf32>
    %18 = vector.shape_cast %17 : vector<1x64x128xf32> to vector<64x128xf32>
    %cst_14 = arith.constant dense<0.000000e+00> : vector<16x128xf32>
    %19 = tpu.matmul %16, %18, %cst_14 {dimension_numbers = #tpu.dot_dimension_numbers<[1], [0], [0], [1], [0, 0, 1, 1], [], []>} : vector<16x64xf32>, vector<64x128xf32>, vector<16x128xf32> -> vector<16x128xf32>
    %20 = arith.addf %12, %19 : vector<16x128xf32>
    %c0_15 = arith.constant 0 : index
    %c0_16 = arith.constant 0 : index
    %21 = vector.load %arg6[%c0_15, %c0_16] : memref<1x128xf32, #tpu.memory_space<vmem>>, vector<1x128xf32>
    %22 = vector.broadcast %21 : vector<1x128xf32> to vector<16x128xf32>
    %23 = arith.addf %20, %22 : vector<16x128xf32>
    %cst_17 = arith.constant dense<0.000000e+00> : vector<128xf32>
    %24 = vector.multi_reduction <add>, %23, %cst_17 [0] : vector<16x128xf32> to vector<128xf32>
    %25 = vector.shape_cast %24 : vector<128xf32> to vector<1x128xf32>
    %c8_i32 = arith.constant 8 : i32
    %26 = tpu.dynamic_rotate %25 by %c8_i32 dim 1 : vector<1x128xf32>, i32 -> vector<1x128xf32>
    %27 = arith.addf %25, %26 : vector<1x128xf32>
    %c16_i32 = arith.constant 16 : i32
    %28 = tpu.dynamic_rotate %27 by %c16_i32 dim 1 : vector<1x128xf32>, i32 -> vector<1x128xf32>
    %29 = arith.addf %27, %28 : vector<1x128xf32>
    %c32_i32 = arith.constant 32 : i32
    %30 = tpu.dynamic_rotate %29 by %c32_i32 dim 1 : vector<1x128xf32>, i32 -> vector<1x128xf32>
    %31 = arith.addf %29, %30 : vector<1x128xf32>
    %c64_i32 = arith.constant 64 : i32
    %32 = tpu.dynamic_rotate %31 by %c64_i32 dim 1 : vector<1x128xf32>, i32 -> vector<1x128xf32>
    %33 = arith.addf %31, %32 : vector<1x128xf32>
    %cst_18 = arith.constant 3.906250e-03 : f32
    %34 = vector.broadcast %cst_18 : f32 to vector<1x128xf32>
    %35 = arith.mulf %33, %34 : vector<1x128xf32>
    %36 = vector.broadcast %35 : vector<1x128xf32> to vector<16x128xf32>
    %37 = arith.subf %23, %36 : vector<16x128xf32>
    %38 = arith.mulf %37, %37 : vector<16x128xf32>
    %cst_19 = arith.constant dense<0.000000e+00> : vector<128xf32>
    %39 = vector.multi_reduction <add>, %38, %cst_19 [0] : vector<16x128xf32> to vector<128xf32>
    %40 = vector.shape_cast %39 : vector<128xf32> to vector<1x128xf32>
    %c8_i32_20 = arith.constant 8 : i32
    %41 = tpu.dynamic_rotate %40 by %c8_i32_20 dim 1 : vector<1x128xf32>, i32 -> vector<1x128xf32>
    %42 = arith.addf %40, %41 : vector<1x128xf32>
    %c16_i32_21 = arith.constant 16 : i32
    %43 = tpu.dynamic_rotate %42 by %c16_i32_21 dim 1 : vector<1x128xf32>, i32 -> vector<1x128xf32>
    %44 = arith.addf %42, %43 : vector<1x128xf32>
    %c32_i32_22 = arith.constant 32 : i32
    %45 = tpu.dynamic_rotate %44 by %c32_i32_22 dim 1 : vector<1x128xf32>, i32 -> vector<1x128xf32>
    %46 = arith.addf %44, %45 : vector<1x128xf32>
    %c64_i32_23 = arith.constant 64 : i32
    %47 = tpu.dynamic_rotate %46 by %c64_i32_23 dim 1 : vector<1x128xf32>, i32 -> vector<1x128xf32>
    %48 = arith.addf %46, %47 : vector<1x128xf32>
    %cst_24 = arith.constant 3.906250e-03 : f32
    %49 = vector.broadcast %cst_24 : f32 to vector<1x128xf32>
    %50 = arith.mulf %48, %49 : vector<1x128xf32>
    %cst_25 = arith.constant 9.99999974E-6 : f32
    %51 = vector.broadcast %cst_25 : f32 to vector<1x128xf32>
    %52 = arith.addf %50, %51 : vector<1x128xf32>
    %53 = math.rsqrt %52 : vector<1x128xf32>
    %c0_26 = arith.constant 0 : index
    %c0_27 = arith.constant 0 : index
    %54 = vector.load %arg9[%c0_26, %c0_27] : memref<1x128xf32, #tpu.memory_space<vmem>>, vector<1x128xf32>
    %55 = arith.mulf %54, %53 : vector<1x128xf32>
    %c0_28 = arith.constant 0 : index
    %c0_29 = arith.constant 0 : index
    %56 = vector.load %arg11[%c0_28, %c0_29] : memref<1x128xf32, #tpu.memory_space<vmem>>, vector<1x128xf32>
    %57 = arith.addf %55, %56 : vector<1x128xf32>
    %c0_30 = arith.constant 0 : index
    %c0_31 = arith.constant 0 : index
    %58 = vector.load %arg10[%c0_30, %c0_31] : memref<1x128xf32, #tpu.memory_space<vmem>>, vector<1x128xf32>
    %59 = arith.mulf %35, %55 : vector<1x128xf32>
    %60 = arith.subf %58, %59 : vector<1x128xf32>
    %61 = vector.broadcast %57 : vector<1x128xf32> to vector<16x128xf32>
    %62 = arith.mulf %23, %61 : vector<16x128xf32>
    %63 = vector.broadcast %60 : vector<1x128xf32> to vector<16x128xf32>
    %64 = arith.addf %62, %63 : vector<16x128xf32>
    %cst_32 = arith.constant 0.000000e+00 : f32
    %65 = vector.broadcast %cst_32 : f32 to vector<16x128xf32>
    %66 = arith.cmpf oge, %64, %65 : vector<16x128xf32>
    %cst_33 = arith.constant 2.000000e-01 : f32
    %67 = vector.broadcast %cst_33 : f32 to vector<16x128xf32>
    %68 = arith.mulf %67, %64 : vector<16x128xf32>
    %69 = arith.select %66, %64, %68 : vector<16x128xi1>, vector<16x128xf32>
    %c1_i32_34 = arith.constant 1 : i32
    %70 = tpu.dynamic_rotate %69 by %c1_i32_34 dim 0 : vector<16x128xf32>, i32 -> vector<16x128xf32>
    %c0_35 = arith.constant 0 : index
    %c0_36 = arith.constant 0 : index
    %71 = vector.load %arg12[%c0_35, %c0_36] : memref<16x1xf32, #tpu.memory_space<vmem>>, vector<16x1xf32>
    %72 = vector.broadcast %71 : vector<16x1xf32> to vector<16x128xf32>
    %73 = arith.mulf %70, %72 : vector<16x128xf32>
    %c0_37 = arith.constant 0 : index
    %c0_38 = arith.constant 0 : index
    %c0_39 = arith.constant 0 : index
    %74 = vector.load %arg4[%c0_37, %c0_38, %c0_39] : memref<3x128x128xf32, #tpu.memory_space<vmem>>, vector<1x128x128xf32>
    %75 = vector.shape_cast %74 : vector<1x128x128xf32> to vector<128x128xf32>
    %cst_40 = arith.constant dense<0.000000e+00> : vector<16x128xf32>
    %76 = tpu.matmul %73, %75, %cst_40 {dimension_numbers = #tpu.dot_dimension_numbers<[1], [0], [0], [1], [0, 0, 1, 1], [], []>} : vector<16x128xf32>, vector<128x128xf32>, vector<16x128xf32> -> vector<16x128xf32>
    %c1_41 = arith.constant 1 : index
    %c0_42 = arith.constant 0 : index
    %c0_43 = arith.constant 0 : index
    %77 = vector.load %arg4[%c1_41, %c0_42, %c0_43] : memref<3x128x128xf32, #tpu.memory_space<vmem>>, vector<1x128x128xf32>
    %78 = vector.shape_cast %77 : vector<1x128x128xf32> to vector<128x128xf32>
    %cst_44 = arith.constant dense<0.000000e+00> : vector<16x128xf32>
    %79 = tpu.matmul %69, %78, %cst_44 {dimension_numbers = #tpu.dot_dimension_numbers<[1], [0], [0], [1], [0, 0, 1, 1], [], []>} : vector<16x128xf32>, vector<128x128xf32>, vector<16x128xf32> -> vector<16x128xf32>
    %80 = arith.addf %76, %79 : vector<16x128xf32>
    %c15_i32_45 = arith.constant 15 : i32
    %81 = tpu.dynamic_rotate %69 by %c15_i32_45 dim 0 : vector<16x128xf32>, i32 -> vector<16x128xf32>
    %c0_46 = arith.constant 0 : index
    %c0_47 = arith.constant 0 : index
    %82 = vector.load %arg13[%c0_46, %c0_47] : memref<16x1xf32, #tpu.memory_space<vmem>>, vector<16x1xf32>
    %83 = vector.broadcast %82 : vector<16x1xf32> to vector<16x128xf32>
    %84 = arith.mulf %81, %83 : vector<16x128xf32>
    %c2_48 = arith.constant 2 : index
    %c0_49 = arith.constant 0 : index
    %c0_50 = arith.constant 0 : index
    %85 = vector.load %arg4[%c2_48, %c0_49, %c0_50] : memref<3x128x128xf32, #tpu.memory_space<vmem>>, vector<1x128x128xf32>
    %86 = vector.shape_cast %85 : vector<1x128x128xf32> to vector<128x128xf32>
    %cst_51 = arith.constant dense<0.000000e+00> : vector<16x128xf32>
    %87 = tpu.matmul %84, %86, %cst_51 {dimension_numbers = #tpu.dot_dimension_numbers<[1], [0], [0], [1], [0, 0, 1, 1], [], []>} : vector<16x128xf32>, vector<128x128xf32>, vector<16x128xf32> -> vector<16x128xf32>
    %88 = arith.addf %80, %87 : vector<16x128xf32>
    %c0_52 = arith.constant 0 : index
    %c0_53 = arith.constant 0 : index
    %89 = vector.load %arg7[%c0_52, %c0_53] : memref<1x128xf32, #tpu.memory_space<vmem>>, vector<1x128xf32>
    %90 = vector.broadcast %89 : vector<1x128xf32> to vector<16x128xf32>
    %91 = arith.addf %88, %90 : vector<16x128xf32>
    %cst_54 = arith.constant 0.000000e+00 : f32
    %92 = vector.broadcast %cst_54 : f32 to vector<16x128xf32>
    %93 = arith.cmpf oge, %91, %92 : vector<16x128xf32>
    %cst_55 = arith.constant 2.000000e-01 : f32
    %94 = vector.broadcast %cst_55 : f32 to vector<16x128xf32>
    %95 = arith.mulf %94, %91 : vector<16x128xf32>
    %96 = arith.select %93, %91, %95 : vector<16x128xi1>, vector<16x128xf32>
    %c0_56 = arith.constant 0 : index
    %c0_57 = arith.constant 0 : index
    %97 = vector.load %arg3[%c0_56, %c0_57] : memref<64x128xf32, #tpu.memory_space<vmem>>, vector<64x128xf32>
    %cst_58 = arith.constant dense<0.000000e+00> : vector<16x128xf32>
    %98 = tpu.matmul %1, %97, %cst_58 {dimension_numbers = #tpu.dot_dimension_numbers<[1], [0], [0], [1], [0, 0, 1, 1], [], []>} : vector<16x64xf32>, vector<64x128xf32>, vector<16x128xf32> -> vector<16x128xf32>
    %99 = arith.addf %96, %98 : vector<16x128xf32>
    %c0_59 = arith.constant 0 : index
    %c0_60 = arith.constant 0 : index
    %100 = vector.load %arg8[%c0_59, %c0_60] : memref<1x128xf32, #tpu.memory_space<vmem>>, vector<1x128xf32>
    %101 = vector.broadcast %100 : vector<1x128xf32> to vector<16x128xf32>
    %102 = arith.addf %99, %101 : vector<16x128xf32>
    %c0_61 = arith.constant 0 : index
    %c0_62 = arith.constant 0 : index
    %c0_63 = arith.constant 0 : index
    %103 = vector.load %arg15[%c0_61, %c0_62, %c0_63] : memref<1x16x128xf32, #tpu.memory_space<vmem>>, vector<1x16x128xf32>
    %104 = vector.shape_cast %103 : vector<1x16x128xf32> to vector<16x128xf32>
    %105 = vector.shape_cast %102 : vector<16x128xf32> to vector<1x16x128xf32>
    tpu.vector_store %arg15[%c0_61, %c0_62, %c0_63], %105 {strides = array<i32>} : memref<1x16x128xf32, #tpu.memory_space<vmem>>, vector<1x16x128xf32>,
    %c0_64 = arith.constant 0 : index
    %c0_65 = arith.constant 0 : index
    %106 = vector.load %arg14[%c0_64, %c0_65] : memref<32x16xf32, #tpu.memory_space<vmem>>, vector<32x16xf32>
    %cst_66 = arith.constant dense<0.000000e+00> : vector<32x128xf32>
    %107 = tpu.matmul %106, %102, %cst_66 {dimension_numbers = #tpu.dot_dimension_numbers<[1], [0], [0], [1], [0, 0, 1, 1], [], []>} : vector<32x16xf32>, vector<16x128xf32>, vector<32x128xf32> -> vector<32x128xf32>
    %108 = vector.extract_strided_slice %107 {offsets = [0, 0], sizes = [8, 128], strides = [1, 1]} : vector<32x128xf32> to vector<8x128xf32>
    %c0_67 = arith.constant 0 : index
    %c0_68 = arith.constant 0 : index
    %c0_69 = arith.constant 0 : index
    %109 = vector.load %arg5[%c0_67, %c0_68, %c0_69] : memref<4x128x64xf32, #tpu.memory_space<vmem>>, vector<1x128x64xf32>
    %110 = vector.shape_cast %109 : vector<1x128x64xf32> to vector<128x64xf32>
    %cst_70 = arith.constant dense<0.000000e+00> : vector<8x64xf32>
    %111 = tpu.matmul %108, %110, %cst_70 {dimension_numbers = #tpu.dot_dimension_numbers<[1], [0], [0], [1], [0, 0, 1, 1], [], []>} : vector<8x128xf32>, vector<128x64xf32>, vector<8x64xf32> -> vector<8x64xf32>
    %112 = vector.extract_strided_slice %107 {offsets = [8, 0], sizes = [8, 128], strides = [1, 1]} : vector<32x128xf32> to vector<8x128xf32>
    %c1_71 = arith.constant 1 : index
    %c0_72 = arith.constant 0 : index
    %c0_73 = arith.constant 0 : index
    %113 = vector.load %arg5[%c1_71, %c0_72, %c0_73] : memref<4x128x64xf32, #tpu.memory_space<vmem>>, vector<1x128x64xf32>
    %114 = vector.shape_cast %113 : vector<1x128x64xf32> to vector<128x64xf32>
    %cst_74 = arith.constant dense<0.000000e+00> : vector<8x64xf32>
    %115 = tpu.matmul %112, %114, %cst_74 {dimension_numbers = #tpu.dot_dimension_numbers<[1], [0], [0], [1], [0, 0, 1, 1], [], []>} : vector<8x128xf32>, vector<128x64xf32>, vector<8x64xf32> -> vector<8x64xf32>
    %116 = arith.addf %111, %115 : vector<8x64xf32>
    %117 = vector.extract_strided_slice %107 {offsets = [16, 0], sizes = [8, 128], strides = [1, 1]} : vector<32x128xf32> to vector<8x128xf32>
    %c2_75 = arith.constant 2 : index
    %c0_76 = arith.constant 0 : index
    %c0_77 = arith.constant 0 : index
    %118 = vector.load %arg5[%c2_75, %c0_76, %c0_77] : memref<4x128x64xf32, #tpu.memory_space<vmem>>, vector<1x128x64xf32>
    %119 = vector.shape_cast %118 : vector<1x128x64xf32> to vector<128x64xf32>
    %cst_78 = arith.constant dense<0.000000e+00> : vector<8x64xf32>
    %120 = tpu.matmul %117, %119, %cst_78 {dimension_numbers = #tpu.dot_dimension_numbers<[1], [0], [0], [1], [0, 0, 1, 1], [], []>} : vector<8x128xf32>, vector<128x64xf32>, vector<8x64xf32> -> vector<8x64xf32>
    %121 = arith.addf %116, %120 : vector<8x64xf32>
    %122 = vector.extract_strided_slice %107 {offsets = [24, 0], sizes = [8, 128], strides = [1, 1]} : vector<32x128xf32> to vector<8x128xf32>
    %c3 = arith.constant 3 : index
    %c0_79 = arith.constant 0 : index
    %c0_80 = arith.constant 0 : index
    %123 = vector.load %arg5[%c3, %c0_79, %c0_80] : memref<4x128x64xf32, #tpu.memory_space<vmem>>, vector<1x128x64xf32>
    %124 = vector.shape_cast %123 : vector<1x128x64xf32> to vector<128x64xf32>
    %cst_81 = arith.constant dense<0.000000e+00> : vector<8x64xf32>
    %125 = tpu.matmul %122, %124, %cst_81 {dimension_numbers = #tpu.dot_dimension_numbers<[1], [0], [0], [1], [0, 0, 1, 1], [], []>} : vector<8x128xf32>, vector<128x64xf32>, vector<8x64xf32> -> vector<8x64xf32>
    %126 = arith.addf %121, %125 : vector<8x64xf32>
    %c0_82 = arith.constant 0 : index
    %c0_83 = arith.constant 0 : index
    %c0_84 = arith.constant 0 : index
    %127 = vector.load %arg16[%c0_82, %c0_83, %c0_84] : memref<1x8x64xf32, #tpu.memory_space<vmem>>, vector<1x8x64xf32>
    %128 = vector.shape_cast %127 : vector<1x8x64xf32> to vector<8x64xf32>
    %129 = vector.shape_cast %126 : vector<8x64xf32> to vector<1x8x64xf32>
    tpu.vector_store %arg16[%c0_82, %c0_83, %c0_84], %129 {strides = array<i32>} : memref<1x8x64xf32, #tpu.memory_space<vmem>>, vector<1x8x64xf32>,
    return
  }
  func.func @transform_0(%arg0: i32) -> (i32, i32, i32) {
    %c0_i32 = arith.constant 0 : i32
    %c0_i32_0 = arith.constant 0 : i32
    %c0_i32_1 = arith.constant 0 : i32
    return %arg0, %c0_i32, %c0_i32_0 : i32, i32, i32
  }
  func.func @transform_1(%arg0: i32) -> (i32, i32, i32) {
    %c0_i32 = arith.constant 0 : i32
    %c0_i32_0 = arith.constant 0 : i32
    %c0_i32_1 = arith.constant 0 : i32
    %c0_i32_2 = arith.constant 0 : i32
    return %c0_i32, %c0_i32_0, %c0_i32_1 : i32, i32, i32
  }
  func.func @transform_2(%arg0: i32) -> (i32, i32) {
    %c0_i32 = arith.constant 0 : i32
    %c0_i32_0 = arith.constant 0 : i32
    %c0_i32_1 = arith.constant 0 : i32
    return %c0_i32, %c0_i32_0 : i32, i32
  }
  func.func @transform_3(%arg0: i32) -> (i32, i32, i32) {
    %c0_i32 = arith.constant 0 : i32
    %c0_i32_0 = arith.constant 0 : i32
    %c0_i32_1 = arith.constant 0 : i32
    %c0_i32_2 = arith.constant 0 : i32
    return %c0_i32, %c0_i32_0, %c0_i32_1 : i32, i32, i32
  }
  func.func @transform_4(%arg0: i32) -> (i32, i32, i32) {
    %c0_i32 = arith.constant 0 : i32
    %c0_i32_0 = arith.constant 0 : i32
    %c0_i32_1 = arith.constant 0 : i32
    %c0_i32_2 = arith.constant 0 : i32
    return %c0_i32, %c0_i32_0, %c0_i32_1 : i32, i32, i32
  }
  func.func @transform_5(%arg0: i32) -> (i32, i32) {
    %c0_i32 = arith.constant 0 : i32
    %c0_i32_0 = arith.constant 0 : i32
    %c0_i32_1 = arith.constant 0 : i32
    return %c0_i32, %c0_i32_0 : i32, i32
  }
  func.func @transform_6(%arg0: i32) -> (i32, i32) {
    %c0_i32 = arith.constant 0 : i32
    %c0_i32_0 = arith.constant 0 : i32
    %c0_i32_1 = arith.constant 0 : i32
    return %c0_i32, %c0_i32_0 : i32, i32
  }
  func.func @transform_7(%arg0: i32) -> (i32, i32) {
    %c0_i32 = arith.constant 0 : i32
    %c0_i32_0 = arith.constant 0 : i32
    %c0_i32_1 = arith.constant 0 : i32
    return %c0_i32, %c0_i32_0 : i32, i32
  }
  func.func @transform_8(%arg0: i32) -> (i32, i32) {
    %c0_i32 = arith.constant 0 : i32
    %c0_i32_0 = arith.constant 0 : i32
    %c0_i32_1 = arith.constant 0 : i32
    return %c0_i32, %c0_i32_0 : i32, i32
  }
  func.func @transform_9(%arg0: i32) -> (i32, i32) {
    %c0_i32 = arith.constant 0 : i32
    %c0_i32_0 = arith.constant 0 : i32
    %c0_i32_1 = arith.constant 0 : i32
    return %c0_i32, %c0_i32_0 : i32, i32
  }
  func.func @transform_10(%arg0: i32) -> (i32, i32) {
    %c0_i32 = arith.constant 0 : i32
    %c0_i32_0 = arith.constant 0 : i32
    %c0_i32_1 = arith.constant 0 : i32
    return %c0_i32, %c0_i32_0 : i32, i32
  }
  func.func @transform_11(%arg0: i32) -> (i32, i32) {
    %c0_i32 = arith.constant 0 : i32
    %c0_i32_0 = arith.constant 0 : i32
    %c0_i32_1 = arith.constant 0 : i32
    return %c0_i32, %c0_i32_0 : i32, i32
  }
  func.func @transform_12(%arg0: i32) -> (i32, i32) {
    %c0_i32 = arith.constant 0 : i32
    %c0_i32_0 = arith.constant 0 : i32
    %c0_i32_1 = arith.constant 0 : i32
    return %c0_i32, %c0_i32_0 : i32, i32
  }
  func.func @transform_13(%arg0: i32) -> (i32, i32) {
    %c0_i32 = arith.constant 0 : i32
    %c0_i32_0 = arith.constant 0 : i32
    %c0_i32_1 = arith.constant 0 : i32
    return %c0_i32, %c0_i32_0 : i32, i32
  }
  func.func @transform_14(%arg0: i32) -> (i32, i32, i32) {
    %c0_i32 = arith.constant 0 : i32
    %c0_i32_0 = arith.constant 0 : i32
    %c0_i32_1 = arith.constant 0 : i32
    return %arg0, %c0_i32, %c0_i32_0 : i32, i32, i32
  }
  func.func @transform_15(%arg0: i32) -> (i32, i32, i32) {
    %c0_i32 = arith.constant 0 : i32
    %c0_i32_0 = arith.constant 0 : i32
    %c0_i32_1 = arith.constant 0 : i32
    return %arg0, %c0_i32, %c0_i32_0 : i32, i32, i32
  }
}

</mosaic_0001>

<bundles_post_ra>
// kernel: tpu_custom_call.1
= control target key start
LH: loop header
LB: loop body
LE: loop exit
PB: predicated region body
PF: predicated region fallthrough
CT: control target
= control target key end

     0   :  { %s3541_s0 = inlined_call_operand.vmem [shape: f32[2,16,64], index: 0, kind: input, shape index: {}]   ;;  %s3542_s1 = inlined_call_operand.vmem [shape: f32[3,64,128], index: 1, kind: input, shape index: {}]   ;;  %s3543_s2 = inlined_call_operand.vmem [shape: f32[64,128], index: 2, kind: input, shape index: {}]   ;;  %s3544_s3 = inlined_call_operand.vmem [shape: f32[3,128,128], index: 3, kind: input, shape index: {}]   ;;  %s3545_s4 = inlined_call_operand.vmem [shape: f32[4,128,64], index: 4, kind: input, shape index: {}]   ;;  %s3546_s5 = inlined_call_operand.vmem [shape: f32[1,128], index: 5, kind: input, shape index: {}]   ;;  %s3547_s6 = inlined_call_operand.vmem [shape: f32[1,128], index: 6, kind: input, shape index: {}]   ;;  %s3548_s7 = inlined_call_operand.vmem [shape: f32[1,128], index: 7, kind: input, shape index: {}]   ;;  %s3549_s8 = inlined_call_operand.vmem [shape: f32[1,128], index: 8, kind: input, shape index: {}]   ;;  %s3550_s9 = inlined_call_operand.vmem [shape: f32[1,128], index: 9, kind: input, shape index: {}]   ;;  %s3551_s10 = inlined_call_operand.vmem [shape: f32[1,128], index: 10, kind: input, shape index: {}]   ;;  %s3552_s11 = inlined_call_operand.vmem [shape: f32[16,1], index: 11, kind: input, shape index: {}]   ;;  %s3553_s12 = inlined_call_operand.vmem [shape: f32[16,1], index: 12, kind: input, shape index: {}]   ;;  %s3554_s13 = inlined_call_operand.vmem [shape: f32[32,16], index: 13, kind: input, shape index: {}]   ;;  %s3555_s14 = inlined_call_operand.hbm [shape: f32[2,16,128], index: 14, kind: output, shape index: {0}]   ;;  %s3556_s15 = inlined_call_operand.hbm [shape: f32[2,8,64], index: 15, kind: output, shape index: {1}]  }
   0x1   :  { %3563 = sst [smem:[#allocation13_spill]] %s3541_s0 }
   0x2   :  { %21 = vsyncpa [#allocation3], 0 }
   0x3   :  { %23 = vsyncpa [#allocation3 + $0x1], 0 }
   0x4   :  { %24 = vsyncpa [#allocation5], 0 }
   0x5   :  { %26 = vsyncpa [#allocation5 + $0x1], 0  ;;  %s2749_s18 = smov 0   ;;  %s2751_s19 = smov 0  }
   0x6   :  { %s2753_s20 = smov 0   ;;  %s2755_s21 = smov 0  }
   0x7 LB: > { %3564 = sst [smem:[#allocation8_spill]] %s2645_s18  ;;  %s2770_s22 = sadd.s32 4294967295, %s2657_s21   ;;  %s2657_s21 = sphi %s2755_s21, %s3576_s21   ;;  %s2653_s20 = sphi %s2753_s20, %s3578_s20   ;;  %s2649_s19 = sphi %s2751_s19, %s3580_s19   ;;  %s2645_s18 = sphi %s2749_s18, %s3579_s18  }
   0x8   : > { %3565 = sst [smem:[#allocation9_spill]] %s2653_s20  ;;  %s1884_s23 = sadd.s32 4294967294, %s2657_s21  }
   0x9   : > { %s2774_s24 = sadd.s32 1, %s2657_s21   ;;  %s338_s25 = sadd.s32 1, %s2653_s20 }
   0xa   : > { %3566 = sst [smem:[#allocation10_spill]] %s2774_s24  ;;  %s335_s26 = ssub.s32 %s2657_s21, %s2774_s24 }
   0xb   : > { %p348_p0 = scmp.ne.s32.totalorder %s2653_s20, %s2649_s19  ;;  %p336_p1 = scmp.eq.s32.totalorder %s335_s26, 0 }
   0xc   : > { %p349_p2 = scmp.eq.s32.totalorder %s2770_s22, 1  ;;  %p354_p3 = scmp.ne.s32.totalorder %s2649_s19, %s2645_s18 }
   0xd   : > { %p355_p4 = scmp.eq.s32.totalorder %s1884_s23, 1  ;;  %p1887_p7 = scmp.ge.s32.totalorder %s2657_s21, 1 }
   0xe   : > { %s2785_s27 = scalar_select %p336_p1, %s2653_s20, %s338_s25  }
   0xf   : > { %p2787_p5 = por %p349_p2, %p348_p0  ;;  %p2791_p6 = por %p355_p4, %p354_p3 }
  0x10   : > { %3567 = sst [smem:[#allocation11_spill]] %s2785_s27  ;;  %p446_p8 = scmp.lt.s32.totalorder %s2657_s21, 3 }
  0x11   : > { %s3569_s29 = scalar_select %p2791_p6, 1, 0 }
  0x12   : > { %p447_p9 = pnand %p1887_p7, %p446_p8 }
  0x13   : > { %3570 = sst [smem:[#allocation12_spill]] %s3569_s29  ;;  %p499_p10 = scmp.lt.s32.totalorder (!%p447_p9), %s2770_s22, 1 }
  0x14   : > { %450 = sbr.rel (%p447_p9) target bundleno = 2037 (0x7f5), region = 76  ;;  %s3571_s0 = sld [smem:[#allocation13_spill]] (!%p447_p9) }
  0x15   : > { %s2661_s17 = smov (!%p447_p9), 16   ;;  %s2662_s23 = smov (!%p447_p9), 32  }
  0x16   : > { %s2663_s25 = smov (!%p447_p9), 64   ;;  %s3245_s26 = sand.u32 (!%p447_p9), 1, %s2649_s19  }
  0x17   : > { %s1888_s20 = sshll.u32 (!%p447_p9), %s3245_s26, 4  ;;  %s2011_s18 = sshll.u32 (!%p447_p9), %s2770_s22, 8 }
  0x18   : > { %s3251_s24 = scalar_lea.vmem (!%p447_p9), [#allocation2], %s1888_s20 }
  0x19   : > { %v712_v0 = vld [vmem:[%s3553_s12] sm:$0xff]  ;;  %v2659_v2 = vmov 0   ;;  %v1899_v3 = vld [vmem:[%s3542_s1 + $0x78] sm:$0xff]  ;;  %v1898_v4 = vld [vmem:[%s3542_s1 + $0x70] sm:$0xff]  ;;  %s500_s30 = scalar_select %p499_p10, %s2770_s22, 1  ;;  %vm544_vm0 = vcmask 523264   ;;  %v508_v31 = vlaneseq }
  0x1a   : > { %v513_v1 = vld [vmem:[%s3552_s11] sm:$0xff]  ;;  %2564 = vset.pattern.permute.xlu1 %v2659_v2  ;;  %2563 = vset.pattern.permute.xlu0 %v2659_v2  ;;  %v713_v5 = vld [vmem:[%s3553_s12 + $0x8] sm:$0xff]  ;;  %v534_v7 = vld [vmem:[%s3542_s1 + $0x38] sm:$0xff]  ;;  %vm1310_vm5 = vcmask 130048   ;;  %vm2665_vm8 = vmmov 0  }
  0x1b   : > { %716 = vperm.xlu1 %2564, %v712_v0   ;;  %517 = vperm.xlu0 %2563, %v513_v1   ;;  %v514_v6 = vld [vmem:[%s3552_s11 + $0x8] sm:$0xff]  ;;  %s2010_s29 = sshll.u32 %s500_s30, 4  ;;  %v533_v10 = vld [vmem:[%s3542_s1 + $0x30] sm:$0xff]  ;;  %v1896_v11 = vld [vmem:[%s3542_s1 + $0x60] sm:$0xff]  ;;  %v2898_v32 = vshrl.u32 %v508_v31, 7  ;;  %s3562_s30 = smov 8  }
  0x1c   : > { %2180 = vmatprep.subr.mxu0 %v1899_v3  ;;  %v1897_v8 = vld [vmem:[%s3542_s1 + $0x68] sm:$0xff]  ;;  %s2826_s16 = scalar_lea.vmem %s3571_s0, %s2010_s29  ;;  %2199 = vmatprep.subr.mxu1 %v534_v7  ;;  %v1895_v13 = vld [vmem:[%s3542_s1 + $0x58] sm:$0xff]  ;;  %v531_v14 = vld [vmem:[%s3542_s1 + $0x20] sm:$0xff] }
  0x1d   : > { %2181 = vmatpush3.msra.mxu0 %v1899_v3  ;;  %v2829_v9 = vld [vmem:[%s2826_s16] sm:$0xff]  ;;  %2200 = vmatpush3.msra.mxu1 %v534_v7  ;;  %v532_v12 = vld [vmem:[%s3542_s1 + $0x28] sm:$0xff]  ;;  %v1894_v15 = vld [vmem:[%s3542_s1 + $0x50] sm:$0xff]  ;;  %vm709_vm1 = vcmp.lt.s32.totalorder %v2898_v32, 7  ;;  %vm510_vm2 = vcmp.lt.s32.totalorder %v2898_v32, 1 }
  0x1e   : > { %2182 = vmatprep.subr.mxu0 %v1898_v4  ;;  %2196 = vmatprep.mubr.msk.f32.mxu0 %vm544_vm0, %v2829_v9  ;;  %v530_v16 = vld [vmem:[%s3542_s1 + $0x18] sm:$0xff]  ;;  %v1893_v17 = vld [vmem:[%s3542_s1 + $0x48] sm:$0xff]  ;;  %v529_v18 = vld [vmem:[%s3542_s1 + $0x10] sm:$0xff]  ;;  %v707_v33 = vrot.slane %v2829_v9, 1  ;;  %v506_v35 = vrot.slane %v2829_v9, 7 }
  0x1f   : > { %721 = vperm.xlu1 %2564, %v713_v5   ;;  %522 = vperm.xlu0 %2563, %v514_v6   ;;  %v1892_v19 = vld [vmem:[%s3542_s1 + $0x40] sm:$0xff]  ;;  %v528_v20 = vld [vmem:[%s3542_s1 + $0x8] sm:$0xff]  ;;  %v1911_v21 = vld [vmem:[%s3542_s1 + $0xb8] sm:$0xff] }
  0x20   : > { %2183 = vmatpush3.msra.mxu0 %v1898_v4  ;;  %2201 = vmatprep.subr.mxu1 %v533_v10  ;;  %v2870_v22 = vld [vmem:[%s2826_s16 + $0x8] sm:$0xff]  ;;  %v1910_v23 = vld [vmem:[%s3542_s1 + $0xb0] sm:$0xff]  ;;  %v527_v24 = vld [vmem:[%s3542_s1] sm:$0xff]  ;;  %s3471_s16 = scalar_lea.hbm %s3555_s14, %s2011_s18 }
  0x21   : > { %2184 = vmatprep.subr.mxu0 %v1897_v8  ;;  %2202 = vmatpush3.msra.mxu1 %v533_v10  ;;  %v1909_v25 = vld [vmem:[%s3542_s1 + $0xa8] sm:$0xff]  ;;  %v1908_v26 = vld [vmem:[%s3542_s1 + $0xa0] sm:$0xff]  ;;  %v1907_v27 = vld [vmem:[%s3542_s1 + $0x98] sm:$0xff]  ;;  %v708_v34 = vrot.slane %v2870_v22, 1  ;;  %v507_v36 = vrot.slane %v2870_v22, 7 }
  0x22   : > { %2185 = vmatpush3.msra.mxu0 %v1897_v8  ;;  %2203 = vmatprep.subr.mxu1 %v532_v12  ;;  %v1906_v28 = vld [vmem:[%s3542_s1 + $0x90] sm:$0xff]  ;;  %v1905_v29 = vld [vmem:[%s3542_s1 + $0x88] sm:$0xff]  ;;  %v1904_v30 = vld [vmem:[%s3542_s1 + $0x80] sm:$0xff] }
  0x23   : > { %2186 = vmatprep.subr.mxu0 %v1896_v11  ;;  %2204 = vmatpush3.msra.mxu1 %v532_v12  ;;  %v710_v37 = vsel %vm709_vm1, %v707_v33, %v708_v34  ;;  %v512_v38 = vsel %vm510_vm2, %v507_v36, %v506_v35  ;;  %v711_v43 = vsel %vm709_vm1, %v708_v34, %v707_v33  ;;  %v1914_v57 = vld [vmem:[%s3546_s5] ss:$0 sm:$0xff]  ;;  %v1930_v34 = vld [vmem:[%s3544_s3 + $0xf8] sm:$0xff] }
  0x24   : > { %2187 = vmatpush3.msra.mxu0 %v1896_v11  ;;  %2205 = vmatprep.subr.mxu1 %v531_v14  ;;  %v511_v44 = vsel %vm510_vm2, %v506_v35, %v507_v36  ;;  %v1929_v35 = vld [vmem:[%s3544_s3 + $0xf0] sm:$0xff]  ;;  %v1928_v36 = vld [vmem:[%s3544_s3 + $0xe8] sm:$0xff] }
  0x25   : > { %2188 = vmatprep.subr.mxu0 %v1895_v13  ;;  %2206 = vmatpush3.msra.mxu1 %v531_v14 }
  0x26   : > { %2189 = vmatpush3.msra.mxu0 %v1895_v13  ;;  %2207 = vmatprep.subr.mxu1 %v530_v16  ;;  %v2942_v13 = vsub.s32 0, %v2898_v32  ;;  %v2664_v32 = vmov 0.0  }
  0x27   : > { %2190 = vmatprep.subr.mxu0 %v1894_v15  ;;  %2208 = vmatpush3.msra.mxu1 %v530_v16 }
  0x28   : > { %2191 = vmatpush3.msra.mxu0 %v1894_v15  ;;  %2209 = vmatprep.subr.mxu1 %v529_v18 }
  0x29   : > { %2192 = vmatprep.subr.mxu0 %v1893_v17  ;;  %2210 = vmatpush3.msra.mxu1 %v529_v18 }
  0x2a   : > { %2193 = vmatpush3.msra.mxu0 %v1893_v17  ;;  %2211 = vmatprep.subr.mxu1 %v528_v20 }
  0x2b   : > { %2194 = vmatprep.subr.mxu0 %v1892_v19  ;;  %2212 = vmatpush3.msra.mxu1 %v528_v20 }
  0x2c   : > { %2195 = vmatpush3.msra.mxu0 %v1892_v19  ;;  %2213 = vmatprep.subr.mxu1 %v527_v24 }
  0x2d   : > { %2218 = vmatprep.subr.mxu0 %v1911_v21  ;;  %2197 = vmatmul.mubr.msk.f32.vlgmr.msra.gmra.mxu0 %vm544_vm0, %v2870_v22 }
  0x2e   : > { %2219 = vmatpush3.msra.mxu0 %v1911_v21  ;;  %2214 = vmatpush3.msra.mxu1 %v527_v24 }
  0x2f   : > { %2220 = vmatprep.subr.mxu0 %v1910_v23  ;;  %2237 = vmatprep.subr.mxu1 %v1930_v34 }
  0x30   : > { %2221 = vmatpush3.msra.mxu0 %v1910_v23 }
  0x31   : > { %2222 = vmatprep.subr.mxu0 %v1909_v25 }
  0x32   : > { %2223 = vmatpush3.msra.mxu0 %v1909_v25 }
  0x33   : > { %2224 = vmatprep.subr.mxu0 %v1908_v26 }
  0x34   : > { %2225 = vmatpush3.msra.mxu0 %v1908_v26 }
  0x35   : > { %2226 = vmatprep.subr.mxu0 %v1907_v27 }
  0x36   : > { %2227 = vmatpush3.msra.mxu0 %v1907_v27 }
  0x37   : > { %2228 = vmatprep.subr.mxu0 %v1906_v28 }
  0x38   : > { %2229 = vmatpush3.msra.mxu0 %v1906_v28 }
  0x39   : > { %2230 = vmatprep.subr.mxu0 %v1905_v29 }
  0x3a   : > { %2231 = vmatpush3.msra.mxu0 %v1905_v29 }
  0x3b   : > { %2232 = vmatprep.subr.mxu0 %v1904_v30 }
  0x3c   : > { %2233 = vmatpush3.msra.mxu0 %v1904_v30 }
  0x96   : > { %v2910_v39 = vpop.permute.xlu1 %716  ;;  %v2912_v40 = vpop.permute.xlu0 %517 }
  0x97   : > { %v724_v41 = vmul.f32 %v2910_v39, %v710_v37  ;;  %v525_v42 = vmul.f32 %v2912_v40, %v512_v38  ;;  %v1927_v37 = vld [vmem:[%s3544_s3 + $0xe0] sm:$0xff]  ;;  %v927_v38 = vld [vmem:[%s3544_s3 + $0x78] sm:$0xff] }
  0x98   : > { %2272 = vmatprep.subr.mxu0 %v927_v38 }
  0x99   : > { %2215 = vmatprep.mubr.msk.f32.mxu1 %vm544_vm0, %v525_v42  ;;  %2234 = vmatprep.mubr.msk.f32.mxu0 %vm544_vm0, %v724_v41  ;;  %v1926_v41 = vld [vmem:[%s3544_s3 + $0xd8] sm:$0xff]  ;;  %v926_v42 = vld [vmem:[%s3544_s3 + $0x70] sm:$0xff] }
  0x9a   : > { %v2922_v45 = vpop.permute.xlu1 %721  ;;  %v2924_v46 = vpop.permute.xlu0 %522 }
  0x9b   : > { %v725_v47 = vmul.f32 %v2922_v45, %v711_v43  ;;  %v526_v48 = vmul.f32 %v2924_v46, %v511_v44  ;;  %v1925_v43 = vld [vmem:[%s3544_s3 + $0xd0] sm:$0xff]  ;;  %v925_v44 = vld [vmem:[%s3544_s3 + $0x68] sm:$0xff] }
  0x9d   : > { %2216 = vmatmul.mubr.msk.f32.vlgmr.msra.gmra.mxu1 %vm544_vm0, %v526_v48  ;;  %2235 = vmatmul.mubr.msk.f32.vlgmr.msra.gmra.mxu0 %vm544_vm0, %v725_v47  ;;  %v1924_v48 = vld [vmem:[%s3544_s3 + $0xc8] sm:$0xff] }
  0x9e   : > { %2238 = vmatpush3.msra.mxu1 %v1930_v34  ;;  %2273 = vmatpush3.msra.mxu0 %v927_v38 }
  0x9f   : > { %2239 = vmatprep.subr.mxu1 %v1929_v35  ;;  %2274 = vmatprep.subr.mxu0 %v926_v42 }
  0xa0   : > { %2240 = vmatpush3.msra.mxu1 %v1929_v35  ;;  %2275 = vmatpush3.msra.mxu0 %v926_v42  ;;  %v1944_v42 = vld [vmem:[%s3544_s3 + $0x168] sm:$0xff] }
  0xa1   : > { %2241 = vmatprep.subr.mxu1 %v1928_v36  ;;  %2276 = vmatprep.subr.mxu0 %v925_v44 }
  0xa2   : > { %2242 = vmatpush3.msra.mxu1 %v1928_v36  ;;  %2277 = vmatpush3.msra.mxu0 %v925_v44 }
  0xa3   : > { %2243 = vmatprep.subr.mxu1 %v1927_v37 }
  0xa4   : > { %2244 = vmatpush3.msra.mxu1 %v1927_v37 }
  0xa5   : > { %2245 = vmatprep.subr.mxu1 %v1926_v41 }
  0xa6   : > { %2246 = vmatpush3.msra.mxu1 %v1926_v41  ;;  %v1945_v41 = vld [vmem:[%s3544_s3 + $0x170] sm:$0xff] }
  0xa7   : > { %2247 = vmatprep.subr.mxu1 %v1925_v43 }
  0xa8   : > { %2248 = vmatpush3.msra.mxu1 %v1925_v43 }
  0xa9   : > { %2249 = vmatprep.subr.mxu1 %v1924_v48 }
  0xaa   : > { %2250 = vmatpush3.msra.mxu1 %v1924_v48 }
  0xed   : > { %v2198_v49 = vpop.f32.mrf.mxu0 }
  0xef   : > { %v617_v50 = vpop.f32.mrf.mxu0 }
 0x15d   : > { %v2217_v51 = vpop.f32.mrf.mxu1  ;;  %v2236_v52 = vpop.f32.mrf.mxu0 }
 0x15e   : > { %v704_v53 = vadd.f32 %v2217_v51, %v2198_v49  ;;  %v1923_v51 = vld [vmem:[%s3544_s3 + $0xc0] sm:$0xff] }
 0x15f   : > { %v698_v54 = vpop.f32.mrf.mxu1  ;;  %v807_v58 = vpop.f32.mrf.mxu0  ;;  %2251 = vmatprep.subr.mxu1 %v1923_v51 }
 0x160   : > { %v817_v55 = vadd.f32 %v2236_v52, %v704_v53  ;;  %v699_v56 = vadd.f32 %v698_v54, %v617_v50  ;;  %v924_v50 = vld [vmem:[%s3544_s3 + $0x60] sm:$0xff]  ;;  %v923_v52 = vld [vmem:[%s3544_s3 + $0x58] sm:$0xff]  ;;  %v922_v54 = vld [vmem:[%s3544_s3 + $0x50] sm:$0xff]  ;;  %2252 = vmatpush3.msra.mxu1 %v1923_v51 }
 0x161   : > { %2278 = vmatprep.subr.mxu0 %v924_v50  ;;  %v1922_v53 = vld [vmem:[%s3544_s3 + $0xb8] sm:$0xff]  ;;  %v1943_v51 = vld [vmem:[%s3544_s3 + $0x160] sm:$0xff] }
 0x162   : > { %v816_v59 = vadd.f32 %v807_v58, %v699_v56  ;;  %v2933_v60 = vadd.f32 %v1914_v57, %v817_v55  ;;  %2279 = vmatpush3.msra.mxu0 %v924_v50  ;;  %v1921_v55 = vld [vmem:[%s3544_s3 + $0xb0] sm:$0xff]  ;;  %2253 = vmatprep.subr.mxu1 %v1922_v53  ;;  %v921_v56 = vld [vmem:[%s3544_s3 + $0x48] sm:$0xff]  ;;  %v920_v58 = vld [vmem:[%s3544_s3 + $0x40] sm:$0xff] }
 0x163   : > { %2280 = vmatprep.subr.mxu0 %v923_v52  ;;  %2254 = vmatpush3.msra.mxu1 %v1922_v53  ;;  %v1940_v53 = vld [vmem:[%s3544_s3 + $0x148] sm:$0xff] }
 0x164   : > { %v2935_v61 = vadd.f32 %v1914_v57, %v816_v59  ;;  %2281 = vmatpush3.msra.mxu0 %v923_v52  ;;  %v1920_v57 = vld [vmem:[%s3544_s3 + $0xa8] sm:$0xff]  ;;  %2255 = vmatprep.subr.mxu1 %v1921_v55  ;;  %v1919_v59 = vld [vmem:[%s3544_s3 + $0xa0] sm:$0xff]  ;;  %v1942_v52 = vld [vmem:[%s3544_s3 + $0x158] sm:$0xff] }
 0x165   : > { %2282 = vmatprep.subr.mxu0 %v922_v54  ;;  %2256 = vmatpush3.msra.mxu1 %v1921_v55  ;;  %v1939_v55 = vld [vmem:[%s3544_s3 + $0x140] sm:$0xff] }
 0x166   : > { %v827_v62 = vadd.f32 %v2933_v60, %v2935_v61  ;;  %2283 = vmatpush3.msra.mxu0 %v922_v54  ;;  %2257 = vmatprep.subr.mxu1 %v1920_v57  ;;  %v1214_v54 = vld [vmem:[%s3543_s2 + $0x20] sm:$0xff] }
 0x167   : > { %2284 = vmatprep.subr.mxu0 %v921_v56  ;;  %2258 = vmatpush3.msra.mxu1 %v1920_v57  ;;  %v1938_v57 = vld [vmem:[%s3544_s3 + $0x138] sm:$0xff] }
 0x168   : > { %v828_v63 = vrot.slane %v827_v62, 4  ;;  %2285 = vmatpush3.msra.mxu0 %v921_v56  ;;  %2259 = vmatprep.subr.mxu1 %v1919_v59  ;;  %v1213_v56 = vld [vmem:[%s3543_s2 + $0x18] sm:$0xff] }
 0x169   : > { %2286 = vmatprep.subr.mxu0 %v920_v58  ;;  %2260 = vmatpush3.msra.mxu1 %v1919_v59  ;;  %v1937_v59 = vld [vmem:[%s3544_s3 + $0x130] sm:$0xff] }
 0x16a   : > { %v829_v0 = vadd.f32 %v828_v63, %v827_v62  ;;  %v919_v62 = vld [vmem:[%s3544_s3 + $0x38] sm:$0xff]  ;;  %2287 = vmatpush3.msra.mxu0 %v920_v58  ;;  %v1212_v58 = vld [vmem:[%s3543_s2 + $0x10] sm:$0xff] }
 0x16b   : > { %v1918_v63 = vld [vmem:[%s3544_s3 + $0x98] sm:$0xff]  ;;  %2288 = vmatprep.subr.mxu0 %v919_v62 }
 0x16c   : > { %v830_v1 = vrot.slane %v829_v0, 2  ;;  %2289 = vmatpush3.msra.mxu0 %v919_v62  ;;  %2261 = vmatprep.subr.mxu1 %v1918_v63  ;;  %v1211_v62 = vld [vmem:[%s3543_s2 + $0x8] sm:$0xff] }
 0x16d   : > { %2262 = vmatpush3.msra.mxu1 %v1918_v63  ;;  %v1936_v63 = vld [vmem:[%s3544_s3 + $0x128] sm:$0xff] }
 0x16e   : > { %v831_v2 = vadd.f32 %v830_v1, %v829_v0  ;;  %v918_v0 = vld [vmem:[%s3544_s3 + $0x30] sm:$0xff] }
 0x16f   : > { %v1917_v1 = vld [vmem:[%s3544_s3 + $0x90] sm:$0xff]  ;;  %2290 = vmatprep.subr.mxu0 %v918_v0 }
 0x170   : > { %v832_v3 = vrot.slane %v831_v2, 1  ;;  %2291 = vmatpush3.msra.mxu0 %v918_v0  ;;  %2263 = vmatprep.subr.mxu1 %v1917_v1  ;;  %v1210_v0 = vld [vmem:[%s3543_s2] sm:$0xff] }
 0x171   : > { %2264 = vmatpush3.msra.mxu1 %v1917_v1  ;;  %v1935_v1 = vld [vmem:[%s3544_s3 + $0x120] sm:$0xff] }
 0x172   : > { %v833_v4 = vadd.f32 %v832_v3, %v831_v2  ;;  %v917_v2 = vld [vmem:[%s3544_s3 + $0x28] sm:$0xff] }
 0x173   : > { %v1916_v3 = vld [vmem:[%s3544_s3 + $0x88] sm:$0xff]  ;;  %2292 = vmatprep.subr.mxu0 %v917_v2 }
 0x174   : > { %834 = vrot.lane.b32.xlu0 %v833_v4, %s3562_s30  ;;  %2293 = vmatpush3.msra.mxu0 %v917_v2  ;;  %v1934_v2 = vld [vmem:[%s3544_s3 + $0x118] sm:$0xff] }
 0x175   : > { %2265 = vmatprep.subr.mxu1 %v1916_v3 }
 0x176   : > { %2266 = vmatpush3.msra.mxu1 %v1916_v3  ;;  %v1933_v3 = vld [vmem:[%s3544_s3 + $0x110] sm:$0xff] }
 0x1e6   : > { %v835_v5 = vpop.permute.xlu0 %834 }
 0x1e7   : > { %v836_v6 = vadd.f32 %v835_v5, %v833_v4  ;;  %v916_v4 = vld [vmem:[%s3544_s3 + $0x20] sm:$0xff] }
 0x1e8   : > { %v1915_v5 = vld [vmem:[%s3544_s3 + $0x80] sm:$0xff]  ;;  %2294 = vmatprep.subr.mxu0 %v916_v4 }
 0x1e9   : > { %837 = vrot.lane.b32.xlu1 %v836_v6, %s2661_s17  ;;  %2295 = vmatpush3.msra.mxu0 %v916_v4  ;;  %v1932_v4 = vld [vmem:[%s3544_s3 + $0x108] sm:$0xff] }
 0x1ea   : > { %2267 = vmatprep.subr.mxu1 %v1915_v5 }
 0x1eb   : > { %2268 = vmatpush3.msra.mxu1 %v1915_v5 }
 0x25b   : > { %v838_v7 = vpop.permute.xlu1 %837 }
 0x25c   : > { %v839_v8 = vadd.f32 %v838_v7, %v836_v6  ;;  %v915_v6 = vld [vmem:[%s3544_s3 + $0x18] sm:$0xff]  ;;  %v914_v7 = vld [vmem:[%s3544_s3 + $0x10] sm:$0xff] }
 0x25d   : > { %2296 = vmatprep.subr.mxu0 %v915_v6 }
 0x25e   : > { %840 = vrot.lane.b32.xlu0 %v839_v8, %s2662_s23  ;;  %2297 = vmatpush3.msra.mxu0 %v915_v6  ;;  %v1306_v6 = vld [vmem:[%s3554_s13] sm:$0xff] }
 0x25f   : > { %2298 = vmatprep.subr.mxu0 %v914_v7 }
 0x260   : > { %2299 = vmatpush3.msra.mxu0 %v914_v7  ;;  %v1970_v7 = vld [vmem:[%s3545_s4 + $0xf8] sm:$0xff] }
 0x2d0   : > { %v841_v10 = vpop.permute.xlu0 %840 }
 0x2d1   : > { %v842_v11 = vadd.f32 %v841_v10, %v839_v8  ;;  %v1946_v8 = vld [vmem:[%s3544_s3 + $0x178] sm:$0xff]  ;;  %v913_v10 = vld [vmem:[%s3544_s3 + $0x8] sm:$0xff] }
 0x2d2   : > { %2307 = vmatprep.subr.mxu1 %v1946_v8  ;;  %2300 = vmatprep.subr.mxu0 %v913_v10 }
 0x2d3   : > { %843 = vrot.lane.b32.xlu1 %v842_v11, %s2663_s25  ;;  %2301 = vmatpush3.msra.mxu0 %v913_v10  ;;  %v1967_v10 = vld [vmem:[%s3545_s4 + $0xe0] sm:$0xff] }
 0x345   : > { %v844_v12 = vpop.permute.xlu1 %843 }
 0x346   : > { %v845_v14 = vadd.f32 %v844_v12, %v842_v11  ;;  %v912_v11 = vld [vmem:[%s3544_s3] sm:$0xff]  ;;  %v1217_v12 = vld [vmem:[%s3543_s2 + $0x38] sm:$0xff] }
 0x347   : > { %2302 = vmatprep.subr.mxu0 %v912_v11 }
 0x348   : > { %v2944_v15 = vmul.f32 0.00390625, %v845_v14  ;;  %2303 = vmatpush3.msra.mxu0 %v912_v11  ;;  %v1966_v11 = vld [vmem:[%s3545_s4 + $0xd8] sm:$0xff] }
 0x349   : > { %2342 = vmatprep.subr.mxu0 %v1217_v12 }
 0x34a   : > { %v850_v16 = vrot.slane %v2944_v15, %v2942_v13 }
 0x34c   : > { %v851_v17 = vsub.f32 %v2935_v61, %v850_v16  ;;  %v852_v18 = vsub.f32 %v2933_v60, %v850_v16 }
 0x34e   : > { %v853_v19 = vmul.f32 %v851_v17, %v851_v17  ;;  %v854_v20 = vmul.f32 %v852_v18, %v852_v18 }
 0x350   : > { %v855_v21 = vadd.f32 %v854_v20, %v853_v19  ;;  %v877_v19 = vld [vmem:[%s3549_s8] sm:$0x1] }
 0x352   : > { %v856_v23 = vrot.slane %v855_v21, 4 }
 0x354   : > { %v857_v24 = vadd.f32 %v856_v23, %v855_v21  ;;  %v879_v21 = vld [vmem:[%s3551_s10] sm:$0x1] }
 0x356   : > { %v858_v25 = vrot.slane %v857_v24, 2 }
 0x358   : > { %v859_v26 = vadd.f32 %v858_v25, %v857_v24  ;;  %v881_v24 = vld [vmem:[%s3550_s9] sm:$0x1] }
 0x35a   : > { %v860_v27 = vrot.slane %v859_v26, 1 }
 0x35c   : > { %v861_v28 = vadd.f32 %v860_v27, %v859_v26 }
 0x35e   : > { %862 = vrot.lane.b32.xlu0 %v861_v28, %s3562_s30  ;;  %s2666_s30 = smov [#allocation2]  }
 0x3d0   : > { %v863_v29 = vpop.permute.xlu0 %862 }
 0x3d1   : > { %v864_v30 = vadd.f32 %v863_v29, %v861_v28 }
 0x3d3   : > { %865 = vrot.lane.b32.xlu1 %v864_v30, %s2661_s17 }
 0x445   : > { %v866_v31 = vpop.permute.xlu1 %865 }
 0x446   : > { %v867_v33 = vadd.f32 %v866_v31, %v864_v30 }
 0x448   : > { %868 = vrot.lane.b32.xlu0 %v867_v33, %s2662_s23  ;;  %s2571_s23 = sshll.u32 %s2666_s30, 4  ;;  %s2572_s23 = int_to_ptr.vmem [resolvable:$false] %s2571_s23 }
 0x4ba   : > { %v869_v47 = vpop.permute.xlu0 %868 }
 0x4bb   : > { %v2981_v49 = vadd.f32 %v869_v47, %v867_v33 }
 0x4bd   : > { %871 = vrot.lane.b32.xlu1 %v2981_v49, %s2663_s25  ;;  %s1777_s25 = sshll.u32 %s3251_s24, 4  ;;  %s3473_s25 = int_to_ptr.vmem [resolvable:$true] %s1777_s25 }
 0x4be   : > { %s2567_s17 = scalar_lea.vmem %s3473_s25, 256  ;;  %p2574_p0 = scmp.lt.s32.totalorder %s3473_s25, %s2572_s23 }
 0x4bf   : > { %p2568_p11 = scmp.ne.s32.totalorder %s3473_s25, %s2567_s17 }
 0x4c1   : > { %p2569_p12 = pnand %p2568_p11, %p2787_p5 }
 0x4c3   : > { %p2570_p13 = pneg %p2569_p12 }
 0x52f   : > { %v872_v14 = vpop.permute.xlu1 %871 }
 0x530   : > { %v873_v16 = vadd.f32 %v872_v14, %v2981_v49  ;;  %v1964_v14 = vld [vmem:[%s3545_s4 + $0xc8] sm:$0xff] }
 0x532   : > { %v874_v17 = vmul.f32 0.00390625, %v873_v16  ;;  %v1963_v16 = vld [vmem:[%s3545_s4 + $0xc0] sm:$0xff] }
 0x534   : > { %v875_v18 = vadd.f32 1e-05, %v874_v17  ;;  %v1962_v17 = vld [vmem:[%s3545_s4 + $0xb8] sm:$0xff] }
 0x536   : > { %2565 = vrsqrt.f32 %v875_v18  ;;  %v1961_v18 = vld [vmem:[%s3545_s4 + $0xb0] sm:$0xff] }
 0x543   : > { %v2566_v20 = vpop.eup %2565 }
 0x544   : > { %v878_v23 = vmul.f32 %v2566_v20, %v877_v19  ;;  %v1960_v19 = vld [vmem:[%s3545_s4 + $0xa8] sm:$0xff]  ;;  %v1959_v20 = vld [vmem:[%s3545_s4 + $0xa0] sm:$0xff] }
 0x546   : > { %v880_v25 = vadd.f32 %v879_v21, %v878_v23  ;;  %v882_v26 = vmul.f32 %v878_v23, %v2944_v15  ;;  %v1958_v21 = vld [vmem:[%s3545_s4 + $0x98] sm:$0xff]  ;;  %v1957_v23 = vld [vmem:[%s3545_s4 + $0x90] sm:$0xff] }
 0x548   : > { %v883_v27 = vsub.f32 %v881_v24, %v882_v26  ;;  %v888_v28 = vrot.slane %v880_v25, %v2942_v13  ;;  %v1956_v24 = vld [vmem:[%s3545_s4 + $0x88] sm:$0xff]  ;;  %v1955_v25 = vld [vmem:[%s3545_s4 + $0x80] sm:$0xff] }
 0x54a   : > { %v890_v29 = vmul.f32 %v888_v28, %v2935_v61  ;;  %v896_v30 = vrot.slane %v883_v27, %v2942_v13  ;;  %v891_v31 = vmul.f32 %v888_v28, %v2933_v60 }
 0x54c   : > { %v898_v33 = vadd.f32 %v896_v30, %v890_v29  ;;  %v899_v34 = vadd.f32 %v896_v30, %v891_v31 }
 0x54e   : > { %vm900_vm3 = vcmp.ge.f32.partialorder %v898_v33, 0.0  ;;  %v902_v35 = vmul.f32 0.2, %v898_v33  ;;  %vm901_vm4 = vcmp.ge.f32.partialorder %v899_v34, 0.0  ;;  %v903_v36 = vmul.f32 0.2, %v899_v34 }
 0x550   : > { %v3072_v37 = vsel %vm900_vm3, %v898_v33, %v902_v35  ;;  %v3074_v38 = vsel %vm901_vm4, %v899_v34, %v903_v36  ;;  %v1947_v33 = vld [vmem:[%s3547_s6] ss:$0 sm:$0xff] }
 0x551   : > { %v906_v15 = vrot.slane %v3072_v37, 7  ;;  %2269 = vmatprep.mubr.f32.mxu1 %v3072_v37  ;;  %v1095_v61 = vrot.slane %v3072_v37, 1  ;;  %v907_v13 = vrot.slane %v3074_v38, 7  ;;  %v1096_v60 = vrot.slane %v3074_v38, 1 }
 0x552   : > { %2270 = vmatmul.mubr.f32.vlgmr.msra.gmra.mxu1 %v3074_v38 }
 0x553   : > { %2308 = vmatpush3.msra.mxu1 %v1946_v8  ;;  %v909_v43 = vsel %vm510_vm2, %v907_v13, %v906_v15  ;;  %v1097_v44 = vsel %vm709_vm1, %v1095_v61, %v1096_v60  ;;  %v908_v47 = vsel %vm510_vm2, %v906_v15, %v907_v13  ;;  %v1098_v5 = vsel %vm709_vm1, %v1096_v60, %v1095_v61  ;;  %v1968_v8 = vld [vmem:[%s3545_s4 + $0xe8] sm:$0xff] }
 0x554   : > { %2309 = vmatprep.subr.mxu1 %v1945_v41  ;;  %v910_v48 = vmul.f32 %v909_v43, %v2912_v40  ;;  %v1099_v49 = vmul.f32 %v1097_v44, %v2910_v39  ;;  %v911_v50 = vmul.f32 %v908_v47, %v2924_v46  ;;  %v1216_v40 = vld [vmem:[%s3543_s2 + $0x30] sm:$0xff]  ;;  %v1215_v46 = vld [vmem:[%s3543_s2 + $0x28] sm:$0xff] }
 0x555   : > { %2310 = vmatpush3.msra.mxu1 %v1945_v41  ;;  %v1941_v39 = vld [vmem:[%s3544_s3 + $0x150] sm:$0xff]  ;;  %v1950_v41 = vld [vmem:[%s3548_s7] ss:$0 sm:$0xff] }
 0x556   : > { %2311 = vmatprep.subr.mxu1 %v1944_v42  ;;  %2304 = vmatprep.mubr.f32.mxu0 %v910_v48 }
 0x557   : > { %2312 = vmatpush3.msra.mxu1 %v1944_v42  ;;  %2339 = vmatprep.mubr.f32.mxu1 %v1099_v49 }
 0x558   : > { %2305 = vmatmul.mubr.f32.vlgmr.msra.gmra.mxu0 %v911_v50  ;;  %2313 = vmatprep.subr.mxu1 %v1943_v51 }
 0x559   : > { %2314 = vmatpush3.msra.mxu1 %v1943_v51  ;;  %2343 = vmatpush3.msra.mxu0 %v1217_v12  ;;  %v1965_v12 = vld [vmem:[%s3545_s4 + $0xd0] sm:$0xff]  ;;  %v1307_v51 = vld [vmem:[%s3554_s13 + $0x8] sm:$0xff] }
 0x55a   : > { %2315 = vmatprep.subr.mxu1 %v1942_v52  ;;  %2344 = vmatprep.subr.mxu0 %v1216_v40 }
 0x55b   : > { %2316 = vmatpush3.msra.mxu1 %v1942_v52  ;;  %2345 = vmatpush3.msra.mxu0 %v1216_v40  ;;  %v1308_v52 = vld [vmem:[%s3554_s13 + $0x10] sm:$0xff]  ;;  %v1423_v40 = vld [vmem:[%s3545_s4 + $0x78] sm:$0xff] }
 0x55c   : > { %2317 = vmatprep.subr.mxu1 %v1941_v39  ;;  %2346 = vmatprep.subr.mxu0 %v1215_v46 }
 0x55d   : > { %2318 = vmatpush3.msra.mxu1 %v1941_v39  ;;  %2347 = vmatpush3.msra.mxu0 %v1215_v46  ;;  %v1422_v39 = vld [vmem:[%s3545_s4 + $0x70] sm:$0xff]  ;;  %v1309_v46 = vld [vmem:[%s3554_s13 + $0x18] sm:$0xff] }
 0x55e   : > { %2319 = vmatprep.subr.mxu1 %v1940_v53  ;;  %2348 = vmatprep.subr.mxu0 %v1214_v54 }
 0x55f   : > { %2320 = vmatpush3.msra.mxu1 %v1940_v53  ;;  %2349 = vmatpush3.msra.mxu0 %v1214_v54  ;;  %v1421_v53 = vld [vmem:[%s3545_s4 + $0x68] sm:$0xff]  ;;  %v1420_v54 = vld [vmem:[%s3545_s4 + $0x60] sm:$0xff] }
 0x560   : > { %2321 = vmatprep.subr.mxu1 %v1939_v55  ;;  %2350 = vmatprep.subr.mxu0 %v1213_v56 }
 0x561   : > { %2322 = vmatpush3.msra.mxu1 %v1939_v55  ;;  %2351 = vmatpush3.msra.mxu0 %v1213_v56  ;;  %v1419_v55 = vld [vmem:[%s3545_s4 + $0x58] sm:$0xff]  ;;  %v1418_v56 = vld [vmem:[%s3545_s4 + $0x50] sm:$0xff] }
 0x562   : > { %2323 = vmatprep.subr.mxu1 %v1938_v57  ;;  %2352 = vmatprep.subr.mxu0 %v1212_v58 }
 0x563   : > { %2324 = vmatpush3.msra.mxu1 %v1938_v57  ;;  %2353 = vmatpush3.msra.mxu0 %v1212_v58  ;;  %v1417_v57 = vld [vmem:[%s3545_s4 + $0x48] sm:$0xff]  ;;  %v1416_v58 = vld [vmem:[%s3545_s4 + $0x40] sm:$0xff] }
 0x564   : > { %2325 = vmatprep.subr.mxu1 %v1937_v59  ;;  %2354 = vmatprep.subr.mxu0 %v1211_v62 }
 0x565   : > { %2326 = vmatpush3.msra.mxu1 %v1937_v59  ;;  %2355 = vmatpush3.msra.mxu0 %v1211_v62  ;;  %v1415_v59 = vld [vmem:[%s3545_s4 + $0x38] sm:$0xff]  ;;  %v1414_v62 = vld [vmem:[%s3545_s4 + $0x30] sm:$0xff] }
 0x566   : > { %2327 = vmatprep.subr.mxu1 %v1936_v63  ;;  %2356 = vmatprep.subr.mxu0 %v1210_v0 }
 0x567   : > { %2328 = vmatpush3.msra.mxu1 %v1936_v63  ;;  %2357 = vmatpush3.msra.mxu0 %v1210_v0  ;;  %v1413_v63 = vld [vmem:[%s3545_s4 + $0x28] sm:$0xff]  ;;  %v1412_v0 = vld [vmem:[%s3545_s4 + $0x20] sm:$0xff] }
 0x568   : > { %2329 = vmatprep.subr.mxu1 %v1935_v1  ;;  %2358 = vmatprep.mubr.msk.f32.mxu0 %vm544_vm0, %v2829_v9  ;;  %v1931_v9 = vld [vmem:[%s3544_s3 + $0x100] sm:$0xff] }
 0x569   : > { %2330 = vmatpush3.msra.mxu1 %v1935_v1  ;;  %2359 = vmatmul.mubr.msk.f32.vlgmr.msra.gmra.mxu0 %vm544_vm0, %v2870_v22  ;;  %v1100_v22 = vmul.f32 %v1098_v5, %v2922_v45  ;;  %v1969_v45 = vld [vmem:[%s3545_s4 + $0xf0] sm:$0xff]  ;;  %v1411_v1 = vld [vmem:[%s3545_s4 + $0x18] sm:$0xff] }
 0x56a   : > { %2331 = vmatprep.subr.mxu1 %v1934_v2  ;;  %2365 = vmatprep.mubr.msk.f32.mxu0 %vm1310_vm5, %v1306_v6  ;;  %v2002_v6 = vld [vmem:[%s3545_s4 + $0x1f8] sm:$0xff] }
 0x56b   : > { %2332 = vmatpush3.msra.mxu1 %v1934_v2  ;;  %v1410_v2 = vld [vmem:[%s3545_s4 + $0x10] sm:$0xff] }
 0x56c   : > { %2333 = vmatprep.subr.mxu1 %v1933_v3 }
 0x56d   : > { %2334 = vmatpush3.msra.mxu1 %v1933_v3  ;;  %v1409_v3 = vld [vmem:[%s3545_s4 + $0x8] sm:$0xff] }
 0x56e   : > { %2335 = vmatprep.subr.mxu1 %v1932_v4 }
 0x56f   : > { %2336 = vmatpush3.msra.mxu1 %v1932_v4  ;;  %v1408_v4 = vld [vmem:[%s3545_s4] sm:$0xff] }
 0x570   : > { %2337 = vmatprep.subr.mxu1 %v1931_v9 }
 0x571   : > { %2338 = vmatpush3.msra.mxu1 %v1931_v9  ;;  %v1986_v9 = vld [vmem:[%s3545_s4 + $0x178] sm:$0xff] }
 0x572   : > { %2340 = vmatmul.mubr.f32.vlgmr.msra.gmra.mxu1 %v1100_v22  ;;  %2371 = vmatprep.subr.mxu1 %v2664_v32  ;;  %v1985_v22 = vld [vmem:[%s3545_s4 + $0x170] sm:$0xff] }
 0x573   : > { %2372 = vmatpush3.msra.mxu1 %v1970_v7  ;;  %2403 = vmatprep.mubr.msk.f32.mxu1 %vm2665_vm8, %v2664_v32 }
 0x574   : > { %2373 = vmatprep.subr.mxu1 %v2664_v32 }
 0x575   : > { %2374 = vmatpush3.msra.mxu1 %v1969_v45  ;;  %v1984_v45 = vld [vmem:[%s3545_s4 + $0x168] sm:$0xff] }
 0x576   : > { %2375 = vmatprep.subr.mxu1 %v2664_v32 }
 0x577   : > { %2376 = vmatpush3.msra.mxu1 %v1968_v8  ;;  %v2001_v8 = vld [vmem:[%s3545_s4 + $0x1f0] sm:$0xff] }
 0x578   : > { %2377 = vmatprep.subr.mxu1 %v2664_v32 }
 0x579   : > { %2378 = vmatpush3.msra.mxu1 %v1967_v10  ;;  %v1983_v10 = vld [vmem:[%s3545_s4 + $0x160] sm:$0xff] }
 0x57a   : > { %2379 = vmatprep.subr.mxu1 %v2664_v32 }
 0x57b   : > { %2380 = vmatpush3.msra.mxu1 %v1966_v11  ;;  %v2000_v11 = vld [vmem:[%s3545_s4 + $0x1e8] sm:$0xff] }
 0x57c   : > { %2381 = vmatprep.subr.mxu1 %v2664_v32 }
 0x57d   : > { %2382 = vmatpush3.msra.mxu1 %v1965_v12  ;;  %v1982_v12 = vld [vmem:[%s3545_s4 + $0x158] sm:$0xff] }
 0x57e   : > { %2383 = vmatprep.subr.mxu1 %v2664_v32 }
 0x57f   : > { %2384 = vmatpush3.msra.mxu1 %v1964_v14  ;;  %v1999_v14 = vld [vmem:[%s3545_s4 + $0x1e0] sm:$0xff] }
 0x580   : > { %2385 = vmatprep.subr.mxu1 %v2664_v32 }
 0x581   : > { %2386 = vmatpush3.msra.mxu1 %v1963_v16  ;;  %v1981_v16 = vld [vmem:[%s3545_s4 + $0x150] sm:$0xff] }
 0x582   : > { %2387 = vmatprep.subr.mxu1 %v2664_v32 }
 0x583   : > { %2388 = vmatpush3.msra.mxu1 %v1962_v17  ;;  %v1998_v17 = vld [vmem:[%s3545_s4 + $0x1d8] sm:$0xff] }
 0x584   : > { %2389 = vmatprep.subr.mxu1 %v2664_v32 }
 0x585   : > { %2390 = vmatpush3.msra.mxu1 %v1961_v18  ;;  %v1980_v18 = vld [vmem:[%s3545_s4 + $0x148] sm:$0xff] }
 0x586   : > { %2391 = vmatprep.subr.mxu1 %v2664_v32 }
 0x587   : > { %2392 = vmatpush3.msra.mxu1 %v1960_v19  ;;  %v1997_v19 = vld [vmem:[%s3545_s4 + $0x1d0] sm:$0xff] }
 0x588   : > { %2393 = vmatprep.subr.mxu1 %v2664_v32 }
 0x589   : > { %2394 = vmatpush3.msra.mxu1 %v1959_v20  ;;  %v1979_v20 = vld [vmem:[%s3545_s4 + $0x140] sm:$0xff] }
 0x58a   : > { %2395 = vmatprep.subr.mxu1 %v2664_v32 }
 0x58b   : > { %2396 = vmatpush3.msra.mxu1 %v1958_v21  ;;  %v1996_v21 = vld [vmem:[%s3545_s4 + $0x1c8] sm:$0xff] }
 0x58c   : > { %2397 = vmatprep.subr.mxu1 %v2664_v32 }
 0x58d   : > { %2398 = vmatpush3.msra.mxu1 %v1957_v23  ;;  %v1978_v23 = vld [vmem:[%s3545_s4 + $0x138] sm:$0xff] }
 0x58e   : > { %2399 = vmatprep.subr.mxu1 %v2664_v32 }
 0x58f   : > { %2400 = vmatpush3.msra.mxu1 %v1956_v24  ;;  %v1995_v24 = vld [vmem:[%s3545_s4 + $0x1c0] sm:$0xff] }
 0x590   : > { %2401 = vmatprep.subr.mxu1 %v2664_v32 }
 0x591   : > { %2402 = vmatpush3.msra.mxu1 %v1955_v25  ;;  %v1977_v25 = vld [vmem:[%s3545_s4 + $0x130] sm:$0xff] }
 0x592   : > { %2441 = vmatprep.subr.mxu1 %v2664_v32 }
 0x612   : > { %v2271_v26 = vpop.f32.mrf.mxu1 }
 0x614   : > { %v1011_v28 = vpop.f32.mrf.mxu1 }
 0x618   : > { %v2306_v27 = vpop.f32.mrf.mxu0 }
 0x619   : > { %v1092_v30 = vadd.f32 %v2306_v27, %v2271_v26  ;;  %v1994_v26 = vld [vmem:[%s3545_s4 + $0x1b8] sm:$0xff]  ;;  %v1976_v27 = vld [vmem:[%s3545_s4 + $0x128] sm:$0xff] }
 0x61a   : > { %v1086_v29 = vpop.f32.mrf.mxu0 }
 0x61b   : > { %v1087_v34 = vadd.f32 %v1086_v29, %v1011_v28  ;;  %v1993_v28 = vld [vmem:[%s3545_s4 + $0x1b0] sm:$0xff]  ;;  %v1975_v29 = vld [vmem:[%s3545_s4 + $0x120] sm:$0xff] }
 0x629   : > { %v2360_v13 = vpop.f32.mrf.mxu0 }
 0x62b   : > { %v1284_v47 = vpop.f32.mrf.mxu0 }
 0x632   : > { %v2341_v31 = vpop.f32.mrf.mxu1 }
 0x633   : > { %v1194_v35 = vadd.f32 %v2341_v31, %v1092_v30  ;;  %v1992_v30 = vld [vmem:[%s3545_s4 + $0x1a8] sm:$0xff]  ;;  %v1974_v31 = vld [vmem:[%s3545_s4 + $0x118] sm:$0xff] }
 0x634   : > { %v1184_v36 = vpop.f32.mrf.mxu1 }
 0x635   : > { %v1203_v37 = vadd.f32 %v1947_v33, %v1194_v35  ;;  %v1193_v38 = vadd.f32 %v1184_v36, %v1087_v34  ;;  %v1973_v34 = vld [vmem:[%s3545_s4 + $0x110] sm:$0xff]  ;;  %v1990_v35 = vld [vmem:[%s3545_s4 + $0x198] sm:$0xff]  ;;  %v1972_v36 = vld [vmem:[%s3545_s4 + $0x108] sm:$0xff] }
 0x637   : > { %v1202_v15 = vadd.f32 %v1947_v33, %v1193_v38  ;;  %vm1205_vm6 = vcmp.ge.f32.partialorder %v1203_v37, 0.0  ;;  %v1207_v61 = vmul.f32 0.2, %v1203_v37  ;;  %v1991_v33 = vld [vmem:[%s3545_s4 + $0x1a0] sm:$0xff] }
 0x639   : > { %v1209_v60 = vsel %vm1205_vm6, %v1203_v37, %v1207_v61  ;;  %vm1204_vm7 = vcmp.ge.f32.partialorder %v1202_v15, 0.0  ;;  %v1206_v42 = vmul.f32 0.2, %v1202_v15  ;;  %v1989_v37 = vld [vmem:[%s3545_s4 + $0x190] sm:$0xff]  ;;  %v1988_v61 = vld [vmem:[%s3545_s4 + $0x188] sm:$0xff] }
 0x63a   : > { %v1294_v43 = vadd.f32 %v2360_v13, %v1209_v60  ;;  %v1987_v13 = vld [vmem:[%s3545_s4 + $0x180] sm:$0xff] }
 0x63b   : > { %v1208_v44 = vsel %vm1204_vm7, %v1202_v15, %v1206_v42  ;;  %v1971_v15 = vld [vmem:[%s3545_s4 + $0x100] sm:$0xff] }
 0x63c   : > { %v1303_v48 = vadd.f32 %v1950_v41, %v1294_v43  ;;  %v1293_v49 = vadd.f32 %v1284_v47, %v1208_v44 }
 0x63e   : > { %1305 = vst [vmem:[%s3251_s24 + $0x8] sm:$0xff] %v1303_v48  ;;  %v1302_v50 = vadd.f32 %v1950_v41, %v1293_v49  ;;  %2361 = vmatprep.subr.mxu0 %v1303_v48 }
 0x63f   : > { %2362 = vmatpush3.msra.mxu0 %v1303_v48 }
 0x640   : > { %1304 = vst [vmem:[%s3251_s24] sm:$0xff] %v1302_v50  ;;  %2363 = vmatprep.subr.mxu0 %v1302_v50  ;;  %s2573_s24 = scalar_lea.vmem %s2572_s23, 512 }
 0x641   : > { %2364 = vmatpush3.msra.mxu0 %v1302_v50  ;;  %p2575_p1 = scmp.lt.s32.totalorder %s2573_s24, %s2567_s17 }
 0x642   : > { %2366 = vmatmul.mubr.msk.f32.vlgmr.msra.gmra.mxu0 %vm1310_vm5, %v1307_v51  ;;  %2406 = vmatprep.subr.mxu0 %v2664_v32 }
 0x643   : > { %2368 = vmatprep.mubr.msk.f32.mxu0 %vm1310_vm5, %v1308_v52  ;;  %2407 = vmatpush3.msra.mxu0 %v1423_v40  ;;  %p2576_p2 = por %p2575_p1, %p2574_p0 }
 0x644   : > { %2408 = vmatprep.subr.mxu0 %v2664_v32 }
 0x645   : > { %2409 = vmatpush3.msra.mxu0 %v1422_v39  ;;  %p2577_p3 = pnand %p2576_p2, %p2570_p13 }
 0x646   : > { %2369 = vmatmul.mubr.msk.f32.gmra.mxu0 %vm1310_vm5, %v1309_v46  ;;  %2410 = vmatprep.subr.mxu0 %v2664_v32 }
 0x647   : > { %2411 = vmatpush3.msra.mxu0 %v1421_v53  ;;  %2438 = vmatprep.mubr.msk.f32.mxu0 %vm2665_vm8, %v2664_v32 }
 0x648   : > { %2412 = vmatprep.subr.mxu0 %v2664_v32 }
 0x649   : > { %2413 = vmatpush3.msra.mxu0 %v1420_v54 }
 0x64a   : > { %2414 = vmatprep.subr.mxu0 %v2664_v32 }
 0x64b   : > { %2415 = vmatpush3.msra.mxu0 %v1419_v55 }
 0x64c   : > { %2416 = vmatprep.subr.mxu0 %v2664_v32 }
 0x64d   : > { %2417 = vmatpush3.msra.mxu0 %v1418_v56 }
 0x64e   : > { %2418 = vmatprep.subr.mxu0 %v2664_v32 }
 0x64f   : > { %2419 = vmatpush3.msra.mxu0 %v1417_v57 }
 0x650   : > { %2420 = vmatprep.subr.mxu0 %v2664_v32 }
 0x651   : > { %2421 = vmatpush3.msra.mxu0 %v1416_v58 }
 0x652   : > { %2422 = vmatprep.subr.mxu0 %v2664_v32 }
 0x653   : > { %2423 = vmatpush3.msra.mxu0 %v1415_v59 }
 0x654   : > { %2424 = vmatprep.subr.mxu0 %v2664_v32 }
 0x655   : > { %2425 = vmatpush3.msra.mxu0 %v1414_v62 }
 0x656   : > { %2426 = vmatprep.subr.mxu0 %v2664_v32 }
 0x657   : > { %2427 = vmatpush3.msra.mxu0 %v1413_v63 }
 0x658   : > { %2428 = vmatprep.subr.mxu0 %v2664_v32 }
 0x659   : > { %2429 = vmatpush3.msra.mxu0 %v1412_v0 }
 0x65a   : > { %2430 = vmatprep.subr.mxu0 %v2664_v32 }
 0x65b   : > { %2431 = vmatpush3.msra.mxu0 %v1411_v1 }
 0x65c   : > { %2432 = vmatprep.subr.mxu0 %v2664_v32 }
 0x65d   : > { %2433 = vmatpush3.msra.mxu0 %v1410_v2 }
 0x65e   : > { %2434 = vmatprep.subr.mxu0 %v2664_v32 }
 0x65f   : > { %2435 = vmatpush3.msra.mxu0 %v1409_v3 }
 0x660   : > { %2436 = vmatprep.subr.mxu0 %v2664_v32 }
 0x661   : > { %2437 = vmatpush3.msra.mxu0 %v1408_v4 }
 0x662   : > { %2476 = vmatprep.subr.mxu0 %v2664_v32 }
 0x702   : > { %v2367_v5 = vpop.f32.mrf.mxu0 }
 0x703   : > { %2404 = vmatmul.mubr.f32.vlgmr.msra.gmra.mxu1 %v2367_v5 }
 0x704   : > { %2442 = vmatpush3.msra.mxu1 %v1986_v9  ;;  %v1389_v7 = vpop.f32.mrf.mxu0  ;;  %2473 = vmatprep.mubr.msk.f32.mxu1 %vm2665_vm8, %v2664_v32 }
 0x705   : > { %2443 = vmatprep.subr.mxu1 %v2664_v32  ;;  %2439 = vmatmul.mubr.f32.vlgmr.msra.gmra.mxu0 %v1389_v7 }
 0x706   : > { %2444 = vmatpush3.msra.mxu1 %v1985_v22  ;;  %2477 = vmatpush3.msra.mxu0 %v2002_v6  ;;  %v2370_v38 = vpop.f32.mrf.mxu0 }
 0x707   : > { %2445 = vmatprep.subr.mxu1 %v2664_v32  ;;  %2478 = vmatprep.subr.mxu0 %v2664_v32 }
 0x708   : > { %2446 = vmatpush3.msra.mxu1 %v1984_v45  ;;  %2479 = vmatpush3.msra.mxu0 %v2001_v8  ;;  %v1399_v60 = vpop.f32.mrf.mxu0 }
 0x709   : > { %2447 = vmatprep.subr.mxu1 %v2664_v32  ;;  %2480 = vmatprep.subr.mxu0 %v2664_v32 }
 0x70a   : > { %2448 = vmatpush3.msra.mxu1 %v1983_v10  ;;  %2481 = vmatpush3.msra.mxu0 %v2000_v11 }
 0x70b   : > { %2449 = vmatprep.subr.mxu1 %v2664_v32  ;;  %2482 = vmatprep.subr.mxu0 %v2664_v32 }
 0x70c   : > { %2450 = vmatpush3.msra.mxu1 %v1982_v12  ;;  %2483 = vmatpush3.msra.mxu0 %v1999_v14 }
 0x70d   : > { %2451 = vmatprep.subr.mxu1 %v2664_v32  ;;  %2484 = vmatprep.subr.mxu0 %v2664_v32 }
 0x70e   : > { %2452 = vmatpush3.msra.mxu1 %v1981_v16  ;;  %2485 = vmatpush3.msra.mxu0 %v1998_v17 }
 0x70f   : > { %2453 = vmatprep.subr.mxu1 %v2664_v32  ;;  %2486 = vmatprep.subr.mxu0 %v2664_v32 }
 0x710   : > { %2454 = vmatpush3.msra.mxu1 %v1980_v18  ;;  %2487 = vmatpush3.msra.mxu0 %v1997_v19 }
 0x711   : > { %2455 = vmatprep.subr.mxu1 %v2664_v32  ;;  %2488 = vmatprep.subr.mxu0 %v2664_v32 }
 0x712   : > { %2456 = vmatpush3.msra.mxu1 %v1979_v20  ;;  %2489 = vmatpush3.msra.mxu0 %v1996_v21 }
 0x713   : > { %2457 = vmatprep.subr.mxu1 %v2664_v32  ;;  %2490 = vmatprep.subr.mxu0 %v2664_v32 }
 0x714   : > { %2458 = vmatpush3.msra.mxu1 %v1978_v23  ;;  %2491 = vmatpush3.msra.mxu0 %v1995_v24 }
 0x715   : > { %2459 = vmatprep.subr.mxu1 %v2664_v32  ;;  %2492 = vmatprep.subr.mxu0 %v2664_v32 }
 0x716   : > { %2460 = vmatpush3.msra.mxu1 %v1977_v25  ;;  %2493 = vmatpush3.msra.mxu0 %v1994_v26 }
 0x717   : > { %2461 = vmatprep.subr.mxu1 %v2664_v32  ;;  %2494 = vmatprep.subr.mxu0 %v2664_v32 }
 0x718   : > { %2462 = vmatpush3.msra.mxu1 %v1976_v27  ;;  %2495 = vmatpush3.msra.mxu0 %v1993_v28 }
 0x719   : > { %2463 = vmatprep.subr.mxu1 %v2664_v32  ;;  %2496 = vmatprep.subr.mxu0 %v2664_v32 }
 0x71a   : > { %2464 = vmatpush3.msra.mxu1 %v1975_v29  ;;  %2497 = vmatpush3.msra.mxu0 %v1992_v30 }
 0x71b   : > { %2465 = vmatprep.subr.mxu1 %v2664_v32  ;;  %2498 = vmatprep.subr.mxu0 %v2664_v32 }
 0x71c   : > { %2466 = vmatpush3.msra.mxu1 %v1974_v31  ;;  %2499 = vmatpush3.msra.mxu0 %v1991_v33 }
 0x71d   : > { %2467 = vmatprep.subr.mxu1 %v2664_v32  ;;  %2500 = vmatprep.subr.mxu0 %v2664_v32 }
 0x71e   : > { %2468 = vmatpush3.msra.mxu1 %v1973_v34  ;;  %2501 = vmatpush3.msra.mxu0 %v1990_v35 }
 0x71f   : > { %2469 = vmatprep.subr.mxu1 %v2664_v32  ;;  %2502 = vmatprep.subr.mxu0 %v2664_v32 }
 0x720   : > { %2470 = vmatpush3.msra.mxu1 %v1972_v36  ;;  %2503 = vmatpush3.msra.mxu0 %v1989_v37 }
 0x721   : > { %2471 = vmatprep.subr.mxu1 %v2664_v32  ;;  %2504 = vmatprep.subr.mxu0 %v2664_v32 }
 0x722   : > { %2472 = vmatpush3.msra.mxu1 %v1971_v15  ;;  %2505 = vmatpush3.msra.mxu0 %v1988_v61 }
 0x723   : > { %2474 = vmatmul.mubr.f32.vlgmr.msra.gmra.mxu1 %v1399_v60  ;;  %2506 = vmatprep.subr.mxu0 %v2664_v32 }
 0x724   : > { %2507 = vmatpush3.msra.mxu0 %v1987_v13  ;;  %2508 = vmatprep.mubr.msk.f32.mxu0 %vm2665_vm8, %v2664_v32 }
 0x725   : > { %2509 = vmatmul.mubr.f32.vlgmr.msra.gmra.mxu0 %v2370_v38 }
 0x726   : > { %2580 = shalt.err (!%p2577_p3)
}
 0x727   : > { %s2581_s18 = scalar_lea.hbm %s3471_s16, 256  ;;  %s2585_s30 = scalar_lea.hbm %s3555_s14, 512 }
 0x728   : > { %p2582_p4 = scmp.ne.s32.totalorder %s3471_s16, %s2581_s18  ;;  %p2586_p9 = scmp.lt.s32.totalorder %s3471_s16, %s3555_s14 }
 0x729   : > { %p2587_p10 = scmp.lt.s32.totalorder %s2585_s30, %s2581_s18 }
 0x72a   : > { %p2583_p7 = pnand %p2582_p4, %p2787_p5 }
 0x72b   : > { %p2588_p11 = por %p2587_p10, %p2586_p9 }
 0x72c   : > { %p2584_p8 = pneg %p2583_p7 }
 0x72e   : > { %p2589_p12 = pnand %p2588_p11, %p2584_p8 }
 0x730   : > { %2592 = shalt.err (!%p2589_p12)
}
 0x731   : > { %s2667_s17 = smov 128   ;;  %s3572_s23 = smov 8  }
 0x732   : > { %s3573_s24 = scalar_lea.sflag [#allocation3], %s3245_s26  ;;  %s1889_s0 = sshll.u32 %s3245_s26, 3 }
 0x733   : > { %2511 = dma.vmem_to_hbm [thread:$0]  (%p2787_p5), %s3473_s25, 256, %s3471_s16, %s3573_s24, %s2667_s17, %s2667_s17, %s3572_s23  }
 0x734   : > { %s2007_s27 = sshll.u32 %s2770_s22, 7  ;;  %s498_s18 = scalar_lea.vmem [#allocation4], %s1889_s0 }
 0x735   : > { %s1793_s29 = sshll.u32 %s498_s18, 4  ;;  %s3504_s25 = scalar_lea.hbm %s3556_s15, %s2007_s27  ;;  %s1794_s29 = int_to_ptr.vmem [resolvable:$true] %s1793_s29 }
 0x736   : > { %s1764_s16 = scalar_lea.sflag [#allocation5], %s3245_s26  ;;  %s2593_s17 = scalar_lea.vmem %s1794_s29, 128 }
 0x737   : > { %p2594_p13 = scmp.ne.s32.totalorder %s1794_s29, %s2593_s17  ;;  %s2668_s22 = smov [#allocation4]  }
 0x738   : > { %s2597_s23 = sshll.u32 %s2668_s22, 4  ;;  %s2598_s23 = int_to_ptr.vmem [resolvable:$false] %s2597_s23 }
 0x739   : > { %p2595_p0 = pnand %p2594_p13, %p2787_p5  ;;  %s2599_s24 = scalar_lea.vmem %s2598_s23, 256 }
 0x73a   : > { %p2600_p2 = scmp.lt.s32.totalorder %s1794_s29, %s2598_s23  ;;  %p2601_p3 = scmp.lt.s32.totalorder %s2599_s24, %s2593_s17 }
 0x73b   : > { %p2596_p1 = pneg %p2595_p0 }
 0x73c   : > { %p2602_p4 = por %p2601_p3, %p2600_p2 }
 0x73e   : > { %p2603_p7 = pnand %p2602_p4, %p2596_p1 }
 0x7c3   : > { %v1507_v32 = vpop.f32.mrf.mxu1 }
 0x7c5   : > { %v2405_v41 = vpop.f32.mrf.mxu1  ;;  %v1577_v42 = vpop.f32.mrf.mxu0 }
 0x7c6   : > { %v1578_v44 = vadd.f32 %v1577_v42, %v1507_v32 }
 0x7c7   : > { %v2440_v43 = vpop.f32.mrf.mxu0 }
 0x7e3   : > { %v1664_v47 = vpop.f32.mrf.mxu1 }
 0x7e4   : > { %v1668_v48 = vadd.f32 %v1664_v47, %v1578_v44 }
 0x7e5   : > { %v2475_v49 = vpop.f32.mrf.mxu1  ;;  %v1752_v50 = vpop.f32.mrf.mxu0 }
 0x7e6   : > { %v1756_v51 = vadd.f32 %v1752_v50, %v1668_v48 }
 0x7e7   : > { %v2510_v52 = vpop.f32.mrf.mxu0 }
 0x7e8   : > { %1757 = vst.msk [vmem:[%s498_s18] sm:$0xff] %vm544_vm0, %v1756_v51 }
 0x7e9   : > { %2606 = shalt.err (!%p2603_p7)
}
 0x7ea   : > { %s2607_s0 = scalar_lea.hbm %s3504_s25, 128  ;;  %s2611_s18 = scalar_lea.hbm %s3556_s15, 256 }
 0x7eb   : > { %p2608_p8 = scmp.ne.s32.totalorder %s3504_s25, %s2607_s0  ;;  %p2612_p11 = scmp.lt.s32.totalorder %s3504_s25, %s3556_s15 }
 0x7ec   : > { %p2613_p12 = scmp.lt.s32.totalorder %s2611_s18, %s2607_s0 }
 0x7ed   : > { %p2609_p9 = pnand %p2608_p8, %p2787_p5 }
 0x7ee   : > { %p2614_p13 = por %p2613_p12, %p2612_p11 }
 0x7ef   : > { %p2610_p10 = pneg %p2609_p9 }
 0x7f1   : > { %p2615_p0 = pnand %p2614_p13, %p2610_p10 }
 0x7f3   : > { %2618 = shalt.err (!%p2615_p0)
}
 0x7f4   : > { %2512 = dma.vmem_to_hbm [thread:$0]  (%p2787_p5), %s1794_s29, 128, %s3504_s25, %s1764_s16  }
 0x7f5 PF: > { %s3574_s17 = sld [smem:[#allocation8_spill]]  ;;  %p2522_p1 = scmp.ge.s32.totalorder %s2657_s21, 2 }
 0x7f7   : > { %p2516_p2 = pnand %p2522_p1, %p2791_p6 }
 0x7f9   : > { %p2517_p3 = pneg %p2516_p2 }
 0x7fb   : > { %s1805_s23 = sand.u32 1, %s3574_s17  }
 0x7fc   : > { %s1806_s24 = scalar_lea.sflag [#allocation3], %s1805_s23 }
 0x7fd   : > { %2636 = dma.done.wait (%p2517_p3), %s1806_s24, 256  }
 0x7fe   : > { %2638 = vsyncadd (%p2517_p3), %s1806_s24, 4294967040  ;;  %s1815_s0 = scalar_lea.sflag [#allocation5], %s1805_s23 }
 0x7ff   : > { %2640 = dma.done.wait (%p2517_p3), %s1815_s0, 128  }
 0x800   : > { %2642 = vsyncadd (%p2517_p3), %s1815_s0, 4294967168  ;;  %s3576_s21 = sld [smem:[#allocation10_spill]]  ;;  %s3579_s18 = smov %s2649_s19 }
 0x801   : > { %s3577_s28 = sld [smem:[#allocation9_spill]] }
 0x802   : > { %s3578_s20 = sld [smem:[#allocation11_spill]] }
 0x806   : > { %p29_p5 = scmp.ge.s32.totalorder %s3576_s21, 4  }
 0x807   : > { %s3580_s19 = smov %s3577_s28 }
 0x808   :  { %31 = sbr.rel (!%p29_p5) target bundleno = 7 (0x7), region = 135 }
 0x80d   :  { %1820 = vsyncpa [#allocation3], 1 }
 0x80e   :  { %1822 = vsyncpa [#allocation3 + $0x1], 1 }
 0x80f   :  { %1823 = vsyncpa [#allocation5], 1 }
 0x810   :  { %1825 = vsyncpa [#allocation5 + $0x1], 1 }

</bundles_post_ra>
